<compile_context>
chip_gen: v6e
topology: v6e:2x2x1
jax: 0.10.0
libtpu: 0.0.40
codegen_flags: <defaults>
</compile_context>

<pallas_src>
import functools

import jax
import jax.numpy as jnp
from jax import lax
from jax.experimental import pallas as pl
from jax.experimental.pallas import tpu as pltpu


def _cbam_kernel(x_ref, w1t_ref, w2t_ref, taps_ref, o_ref, *, Bt, C, HW, W, K, pad):
    # x_ref   : (Bt, C, HW)      f32 in VMEM (lane-dense, HW last)
    # w1t_ref : (C, Cr)          f32        w2t_ref: (Cr, C) f32
    # taps_ref: (K*K, 2*Bt, HW)  f32  per-lane conv taps with boundary masks
    #           folded in (rows 0..Bt-1 -> max-channel taps, Bt..2Bt-1 -> mean)
    # o_ref   : (Bt, C, HW)      f32
    x = x_ref[...]                                        # (Bt, C, HW)

    # ---- channel attention: one fused MLP over both pools and all Bt images ----
    maxp = jnp.max(x, axis=2)                             # (Bt, C)  AdaptiveMaxPool2d(1)
    avgp = jnp.sum(x, axis=2) * (1.0 / HW)                # (Bt, C)  AdaptiveAvgPool2d(1)
    pooled = jnp.concatenate([maxp, avgp], axis=0)        # (2*Bt, C)
    h = jnp.dot(pooled, w1t_ref[...], preferred_element_type=jnp.float32)   # (2*Bt, Cr)
    h = jnp.maximum(h, 0.0)                               # ReLU
    mlp_out = jnp.dot(h, w2t_ref[...], preferred_element_type=jnp.float32)  # (2*Bt, C)
    ch_att = jax.nn.sigmoid(mlp_out[:Bt] + mlp_out[Bt:])  # (Bt, C)
    x1 = x * ch_att[:, :, None]                           # (Bt, C, HW) channel-scaled

    # ---- spatial attention: 7x7 SAME conv in flat lane-dense layout ----
    # planes rows: [max(img0..img{Bt-1}), mean(img0..img{Bt-1})] -> (2*Bt, HW).
    # No HxW reshape: channel reductions land directly in the conv layout.
    planes = jnp.concatenate(
        [jnp.max(x1, axis=1), jnp.sum(x1, axis=1) * (1.0 / C)], axis=0)

    acc = None
    for kh in range(K):
        for kw in range(K):
            t = kh * K + kw
            s = (kh - pad) * W + (kw - pad)               # flat source offset
            amt = (-s) % HW
            rolled = planes if amt == 0 else pltpu.roll(planes, amt, axis=1)
            term = rolled * taps_ref[t]                   # masks folded into taps
            acc = term if acc is None else acc + term     # (2*Bt, HW)

    # conv output per image = max-channel contribution + mean-channel contribution
    sp = jax.nn.sigmoid(acc[:Bt] + acc[Bt:])              # (Bt, HW)
    o_ref[...] = x1 * sp[:, None, :]                      # lane-dense full-block store


def _choose_block_b(B, C, HW, K, budget_bytes=12 << 20):
    """Largest divisor of B, capped at B//2 (>= 2 grid steps so both v7x
    TensorCores get work), whose per-step in+out+taps footprint stays under
    ~12 MiB.  Double-buffered by the pipeline (~2x) this remains below the
    32 MiB default scoped-VMEM limit on v5e/v6e/v7x."""
    per_image = (2 * C * HW + 2 * K * K * HW) * 4
    cap = max(1, B // 2)
    bt = 1
    for cand in range(1, cap + 1):
        if B % cand == 0 and cand * per_image <= budget_bytes:
            bt = cand
    return bt


def _build_tap_table(wc, H, W, K, Bt):
    """Per-lane tap vectors: taps[t, r, p] = wc[ch(r), kh, kw] * inbounds(p, kh, kw),
    with t = kh*K + kw, p = i*W + j, ch(r) = 0 (max) for r < Bt else 1 (mean)."""
    pad = K // 2
    ii = jnp.arange(H, dtype=jnp.int32)[:, None]
    jj = jnp.arange(W, dtype=jnp.int32)[None, :]
    rows = []
    for kh in range(K):
        for kw in range(K):
            si = ii + kh - pad
            sj = jj + kw - pad
            valid = ((si >= 0) & (si < H) & (sj >= 0) & (sj < W)).astype(jnp.float32)
            vflat = valid.reshape(H * W)
            rows.append(jnp.stack([wc[0, kh, kw] * vflat,
                                   wc[1, kh, kw] * vflat], axis=0))   # (2, HW)
    taps_small = jnp.stack(rows, axis=0)                              # (K*K, 2, HW)
    return jnp.repeat(taps_small, Bt, axis=1)                         # (K*K, 2*Bt, HW)


def cbam_forward(x, w1, w2, wc):
    """x: (B, C, H, W) f32; w1: (C//r, C); w2: (C, C//r); wc: (2, K, K)."""
    B, C, H, W = x.shape
    Cr = w1.shape[0]
    K = wc.shape[-1]
    pad = K // 2
    HW = H * W

    # Wrapper-side layout plumbing (free): lane-dense x view, transposed MLP
    # weights, per-lane conv tap table with boundary masks folded in.
    x2 = x.reshape(B, C, HW).astype(jnp.float32)
    w1t = jnp.transpose(w1).astype(jnp.float32)            # (C, Cr)
    w2t = jnp.transpose(w2).astype(jnp.float32)            # (Cr, C)

    Bt = _choose_block_b(B, C, HW, K)
    grid = (B // Bt,)
    taps = _build_tap_table(wc.astype(jnp.float32), H, W, K, Bt)   # (K*K, 2*Bt, HW)

    kernel = functools.partial(_cbam_kernel, Bt=Bt, C=C, HW=HW, W=W, K=K, pad=pad)

    out = pl.pallas_call(
        kernel,
        out_shape=jax.ShapeDtypeStruct((B, C, HW), jnp.float32),
        grid_spec=pltpu.PrefetchScalarGridSpec(
            num_scalar_prefetch=0,
            grid=grid,
            in_specs=[
                pl.BlockSpec((Bt, C, HW), lambda i: (i, 0, 0)),
                pl.BlockSpec((C, Cr), lambda i: (0, 0)),
                pl.BlockSpec((Cr, C), lambda i: (0, 0)),
                pl.BlockSpec((K * K, 2 * Bt, HW), lambda i: (0, 0, 0)),
            ],
            out_specs=pl.BlockSpec((Bt, C, HW), lambda i: (i, 0, 0)),
        ),
        compiler_params=pltpu.CompilerParams(
            dimension_semantics=("parallel",)),   # independent batch steps (v7x megacore)
    )(x2, w1t, w2t, taps)

    return out.reshape(B, C, H, W)


def cbam_reference(x, w1, w2, wc):
    """Pure-JAX reference mirroring the PyTorch forward."""
    maxp = jnp.max(x, axis=(2, 3), keepdims=True)
    avgp = jnp.mean(x, axis=(2, 3), keepdims=True)

    def mlp(p):
        h = jnp.einsum('bcij,rc->brij', p, w1)
        h = jnp.maximum(h, 0.0)
        return jnp.einsum('brij,cr->bcij', h, w2)

    ch = jax.nn.sigmoid(mlp(maxp) + mlp(avgp))
    x1 = ch * x
    mo = jnp.max(x1, axis=1, keepdims=True)
    ao = jnp.mean(x1, axis=1, keepdims=True)
    s = jnp.concatenate([mo, ao], axis=1)                 # (B, 2, H, W)
    conv = lax.conv_general_dilated(
        s, wc[None], window_strides=(1, 1), padding='SAME',
        dimension_numbers=('NCHW', 'OIHW', 'NCHW'))
    return jax.nn.sigmoid(conv) * x1


if __name__ == "__main__":
    B, C, H, W = 2, 32, 16, 16
    reduction, K = 16, 7
    Cr = C // reduction

    key = jax.random.PRNGKey(0)
    kx, k1, k2, k3 = jax.random.split(key, 4)
    x = jax.random.normal(kx, (B, C, H, W), dtype=jnp.float32)
    # Deterministic synthetic weights (shapes match nn.Conv2d(..., bias=False)).
    w1 = jax.random.normal(k1, (Cr, C), dtype=jnp.float32) * (1.0 / C) ** 0.5
    w2 = jax.random.normal(k2, (C, Cr), dtype=jnp.float32) * (1.0 / max(Cr, 1)) ** 0.5
    wc = jax.random.normal(k3, (2, K, K), dtype=jnp.float32) * (1.0 / (2 * K * K)) ** 0.5

    out = cbam_forward(x, w1, w2, wc)
    out = jax.block_until_ready(out)

    ref = cbam_reference(x, w1, w2, wc)
    assert out.shape == (B, C, H, W)
    assert jnp.allclose(out, ref, atol=5e-5, rtol=5e-5), "mismatch vs reference"

    print("KERNEL_OK")
</pallas_src>

<mosaic_0001>
module attributes {stable_mosaic.version = 11 : i64} {
  func.func @_cbam_kernel(%arg0: i32, %arg1: memref<1x32x256xf32, #tpu.memory_space<vmem>>, %arg2: memref<32x2xf32, #tpu.memory_space<vmem>>, %arg3: memref<2x32xf32, #tpu.memory_space<vmem>>, %arg4: memref<49x2x256xf32, #tpu.memory_space<vmem>>, %arg5: memref<1x32x256xf32, #tpu.memory_space<vmem>>) attributes {dimension_semantics = [#tpu.dimension_semantics<parallel>], iteration_bounds = array<i64: 2>, scalar_prefetch = 0 : i64, scratch_operands = 0 : i64, tpu.core_type = #tpu.core_type<tc>, window_params = [{transform_indices = @transform_0, window_bounds = array<i64: 1, 32, 256>}, {pipeline_mode = #tpu.pipeline_mode<synchronous>, transform_indices = @transform_1, window_bounds = array<i64: 32, 2>}, {pipeline_mode = #tpu.pipeline_mode<synchronous>, transform_indices = @transform_2, window_bounds = array<i64: 2, 32>}, {pipeline_mode = #tpu.pipeline_mode<synchronous>, transform_indices = @transform_3, window_bounds = array<i64: 49, 2, 256>}, {transform_indices = @transform_4, window_bounds = array<i64: 1, 32, 256>}]} {
    %c0 = arith.constant 0 : index
    %c0_0 = arith.constant 0 : index
    %c0_1 = arith.constant 0 : index
    %0 = vector.load %arg1[%c0, %c0_0, %c0_1] : memref<1x32x256xf32, #tpu.memory_space<vmem>>, vector<1x32x256xf32>
    %cst = arith.constant dense<0xFF800000> : vector<1x32xf32>
    %1 = vector.multi_reduction <maximumf>, %0, %cst [2] : vector<1x32x256xf32> to vector<1x32xf32>
    %cst_2 = arith.constant dense<0.000000e+00> : vector<1x32xf32>
    %2 = vector.multi_reduction <add>, %0, %cst_2 [2] : vector<1x32x256xf32> to vector<1x32xf32>
    %cst_3 = arith.constant 3.906250e-03 : f32
    %3 = vector.broadcast %cst_3 : f32 to vector<1x32xf32>
    %4 = arith.mulf %2, %3 : vector<1x32xf32>
    %5 = tpu.concatenate %1, %4 in 0 : vector<1x32xf32>, vector<1x32xf32> -> vector<2x32xf32>
    %c0_4 = arith.constant 0 : index
    %c0_5 = arith.constant 0 : index
    %6 = vector.load %arg2[%c0_4, %c0_5] : memref<32x2xf32, #tpu.memory_space<vmem>>, vector<32x2xf32>
    %cst_6 = arith.constant dense<0.000000e+00> : vector<2x2xf32>
    %7 = tpu.matmul %5, %6, %cst_6 {dimension_numbers = #tpu.dot_dimension_numbers<[1], [0], [0], [1], [0, 0, 1, 1], [], []>} : vector<2x32xf32>, vector<32x2xf32>, vector<2x2xf32> -> vector<2x2xf32>
    %cst_7 = arith.constant 0.000000e+00 : f32
    %8 = vector.broadcast %cst_7 : f32 to vector<2x2xf32>
    %9 = arith.maximumf %7, %8 : vector<2x2xf32>
    %c0_8 = arith.constant 0 : index
    %c0_9 = arith.constant 0 : index
    %10 = vector.load %arg3[%c0_8, %c0_9] : memref<2x32xf32, #tpu.memory_space<vmem>>, vector<2x32xf32>
    %cst_10 = arith.constant dense<0.000000e+00> : vector<2x32xf32>
    %11 = tpu.matmul %9, %10, %cst_10 {dimension_numbers = #tpu.dot_dimension_numbers<[1], [0], [0], [1], [0, 0, 1, 1], [], []>} : vector<2x2xf32>, vector<2x32xf32>, vector<2x32xf32> -> vector<2x32xf32>
    %12 = vector.extract_strided_slice %11 {offsets = [0, 0], sizes = [1, 32], strides = [1, 1]} : vector<2x32xf32> to vector<1x32xf32>
    %13 = vector.extract_strided_slice %11 {offsets = [1, 0], sizes = [1, 32], strides = [1, 1]} : vector<2x32xf32> to vector<1x32xf32>
    %14 = arith.addf %12, %13 : vector<1x32xf32>
    %15 = arith.negf %14 : vector<1x32xf32>
    %16 = math.exp %15 : vector<1x32xf32>
    %cst_11 = arith.constant 1.000000e+00 : f32
    %17 = vector.broadcast %cst_11 : f32 to vector<1x32xf32>
    %18 = arith.addf %17, %16 : vector<1x32xf32>
    %19 = arith.divf %17, %18 : vector<1x32xf32>
    %20 = vector.shape_cast %19 : vector<1x32xf32> to vector<1x32x1xf32>
    %21 = vector.broadcast %20 : vector<1x32x1xf32> to vector<1x32x256xf32>
    %22 = arith.mulf %0, %21 : vector<1x32x256xf32>
    %cst_12 = arith.constant dense<0xFF800000> : vector<1x256xf32>
    %23 = vector.multi_reduction <maximumf>, %22, %cst_12 [1] : vector<1x32x256xf32> to vector<1x256xf32>
    %cst_13 = arith.constant dense<0.000000e+00> : vector<1x256xf32>
    %24 = vector.multi_reduction <add>, %22, %cst_13 [1] : vector<1x32x256xf32> to vector<1x256xf32>
    %cst_14 = arith.constant 3.125000e-02 : f32
    %25 = vector.broadcast %cst_14 : f32 to vector<1x256xf32>
    %26 = arith.mulf %24, %25 : vector<1x256xf32>
    %27 = tpu.concatenate %23, %26 in 0 : vector<1x256xf32>, vector<1x256xf32> -> vector<2x256xf32>
    %c51_i32 = arith.constant 51 : i32
    %28 = tpu.dynamic_rotate %27 by %c51_i32 dim 1 : vector<2x256xf32>, i32 -> vector<2x256xf32>
    %c0_15 = arith.constant 0 : index
    %c0_16 = arith.constant 0 : index
    %c0_17 = arith.constant 0 : index
    %29 = vector.load %arg4[%c0_15, %c0_16, %c0_17] : memref<49x2x256xf32, #tpu.memory_space<vmem>>, vector<1x2x256xf32>
    %30 = vector.shape_cast %29 : vector<1x2x256xf32> to vector<2x256xf32>
    %31 = arith.mulf %28, %30 : vector<2x256xf32>
    %c50_i32 = arith.constant 50 : i32
    %32 = tpu.dynamic_rotate %27 by %c50_i32 dim 1 : vector<2x256xf32>, i32 -> vector<2x256xf32>
    %c1 = arith.constant 1 : index
    %c0_18 = arith.constant 0 : index
    %c0_19 = arith.constant 0 : index
    %33 = vector.load %arg4[%c1, %c0_18, %c0_19] : memref<49x2x256xf32, #tpu.memory_space<vmem>>, vector<1x2x256xf32>
    %34 = vector.shape_cast %33 : vector<1x2x256xf32> to vector<2x256xf32>
    %35 = arith.mulf %32, %34 : vector<2x256xf32>
    %36 = arith.addf %31, %35 : vector<2x256xf32>
    %c49_i32 = arith.constant 49 : i32
    %37 = tpu.dynamic_rotate %27 by %c49_i32 dim 1 : vector<2x256xf32>, i32 -> vector<2x256xf32>
    %c2 = arith.constant 2 : index
    %c0_20 = arith.constant 0 : index
    %c0_21 = arith.constant 0 : index
    %38 = vector.load %arg4[%c2, %c0_20, %c0_21] : memref<49x2x256xf32, #tpu.memory_space<vmem>>, vector<1x2x256xf32>
    %39 = vector.shape_cast %38 : vector<1x2x256xf32> to vector<2x256xf32>
    %40 = arith.mulf %37, %39 : vector<2x256xf32>
    %41 = arith.addf %36, %40 : vector<2x256xf32>
    %c48_i32 = arith.constant 48 : i32
    %42 = tpu.dynamic_rotate %27 by %c48_i32 dim 1 : vector<2x256xf32>, i32 -> vector<2x256xf32>
    %c3 = arith.constant 3 : index
    %c0_22 = arith.constant 0 : index
    %c0_23 = arith.constant 0 : index
    %43 = vector.load %arg4[%c3, %c0_22, %c0_23] : memref<49x2x256xf32, #tpu.memory_space<vmem>>, vector<1x2x256xf32>
    %44 = vector.shape_cast %43 : vector<1x2x256xf32> to vector<2x256xf32>
    %45 = arith.mulf %42, %44 : vector<2x256xf32>
    %46 = arith.addf %41, %45 : vector<2x256xf32>
    %c47_i32 = arith.constant 47 : i32
    %47 = tpu.dynamic_rotate %27 by %c47_i32 dim 1 : vector<2x256xf32>, i32 -> vector<2x256xf32>
    %c4 = arith.constant 4 : index
    %c0_24 = arith.constant 0 : index
    %c0_25 = arith.constant 0 : index
    %48 = vector.load %arg4[%c4, %c0_24, %c0_25] : memref<49x2x256xf32, #tpu.memory_space<vmem>>, vector<1x2x256xf32>
    %49 = vector.shape_cast %48 : vector<1x2x256xf32> to vector<2x256xf32>
    %50 = arith.mulf %47, %49 : vector<2x256xf32>
    %51 = arith.addf %46, %50 : vector<2x256xf32>
    %c46_i32 = arith.constant 46 : i32
    %52 = tpu.dynamic_rotate %27 by %c46_i32 dim 1 : vector<2x256xf32>, i32 -> vector<2x256xf32>
    %c5 = arith.constant 5 : index
    %c0_26 = arith.constant 0 : index
    %c0_27 = arith.constant 0 : index
    %53 = vector.load %arg4[%c5, %c0_26, %c0_27] : memref<49x2x256xf32, #tpu.memory_space<vmem>>, vector<1x2x256xf32>
    %54 = vector.shape_cast %53 : vector<1x2x256xf32> to vector<2x256xf32>
    %55 = arith.mulf %52, %54 : vector<2x256xf32>
    %56 = arith.addf %51, %55 : vector<2x256xf32>
    %c45_i32 = arith.constant 45 : i32
    %57 = tpu.dynamic_rotate %27 by %c45_i32 dim 1 : vector<2x256xf32>, i32 -> vector<2x256xf32>
    %c6 = arith.constant 6 : index
    %c0_28 = arith.constant 0 : index
    %c0_29 = arith.constant 0 : index
    %58 = vector.load %arg4[%c6, %c0_28, %c0_29] : memref<49x2x256xf32, #tpu.memory_space<vmem>>, vector<1x2x256xf32>
    %59 = vector.shape_cast %58 : vector<1x2x256xf32> to vector<2x256xf32>
    %60 = arith.mulf %57, %59 : vector<2x256xf32>
    %61 = arith.addf %56, %60 : vector<2x256xf32>
    %c35_i32 = arith.constant 35 : i32
    %62 = tpu.dynamic_rotate %27 by %c35_i32 dim 1 : vector<2x256xf32>, i32 -> vector<2x256xf32>
    %c7 = arith.constant 7 : index
    %c0_30 = arith.constant 0 : index
    %c0_31 = arith.constant 0 : index
    %63 = vector.load %arg4[%c7, %c0_30, %c0_31] : memref<49x2x256xf32, #tpu.memory_space<vmem>>, vector<1x2x256xf32>
    %64 = vector.shape_cast %63 : vector<1x2x256xf32> to vector<2x256xf32>
    %65 = arith.mulf %62, %64 : vector<2x256xf32>
    %66 = arith.addf %61, %65 : vector<2x256xf32>
    %c34_i32 = arith.constant 34 : i32
    %67 = tpu.dynamic_rotate %27 by %c34_i32 dim 1 : vector<2x256xf32>, i32 -> vector<2x256xf32>
    %c8 = arith.constant 8 : index
    %c0_32 = arith.constant 0 : index
    %c0_33 = arith.constant 0 : index
    %68 = vector.load %arg4[%c8, %c0_32, %c0_33] : memref<49x2x256xf32, #tpu.memory_space<vmem>>, vector<1x2x256xf32>
    %69 = vector.shape_cast %68 : vector<1x2x256xf32> to vector<2x256xf32>
    %70 = arith.mulf %67, %69 : vector<2x256xf32>
    %71 = arith.addf %66, %70 : vector<2x256xf32>
    %c33_i32 = arith.constant 33 : i32
    %72 = tpu.dynamic_rotate %27 by %c33_i32 dim 1 : vector<2x256xf32>, i32 -> vector<2x256xf32>
    %c9 = arith.constant 9 : index
    %c0_34 = arith.constant 0 : index
    %c0_35 = arith.constant 0 : index
    %73 = vector.load %arg4[%c9, %c0_34, %c0_35] : memref<49x2x256xf32, #tpu.memory_space<vmem>>, vector<1x2x256xf32>
    %74 = vector.shape_cast %73 : vector<1x2x256xf32> to vector<2x256xf32>
    %75 = arith.mulf %72, %74 : vector<2x256xf32>
    %76 = arith.addf %71, %75 : vector<2x256xf32>
    %c32_i32 = arith.constant 32 : i32
    %77 = tpu.dynamic_rotate %27 by %c32_i32 dim 1 : vector<2x256xf32>, i32 -> vector<2x256xf32>
    %c10 = arith.constant 10 : index
    %c0_36 = arith.constant 0 : index
    %c0_37 = arith.constant 0 : index
    %78 = vector.load %arg4[%c10, %c0_36, %c0_37] : memref<49x2x256xf32, #tpu.memory_space<vmem>>, vector<1x2x256xf32>
    %79 = vector.shape_cast %78 : vector<1x2x256xf32> to vector<2x256xf32>
    %80 = arith.mulf %77, %79 : vector<2x256xf32>
    %81 = arith.addf %76, %80 : vector<2x256xf32>
    %c31_i32 = arith.constant 31 : i32
    %82 = tpu.dynamic_rotate %27 by %c31_i32 dim 1 : vector<2x256xf32>, i32 -> vector<2x256xf32>
    %c11 = arith.constant 11 : index
    %c0_38 = arith.constant 0 : index
    %c0_39 = arith.constant 0 : index
    %83 = vector.load %arg4[%c11, %c0_38, %c0_39] : memref<49x2x256xf32, #tpu.memory_space<vmem>>, vector<1x2x256xf32>
    %84 = vector.shape_cast %83 : vector<1x2x256xf32> to vector<2x256xf32>
    %85 = arith.mulf %82, %84 : vector<2x256xf32>
    %86 = arith.addf %81, %85 : vector<2x256xf32>
    %c30_i32 = arith.constant 30 : i32
    %87 = tpu.dynamic_rotate %27 by %c30_i32 dim 1 : vector<2x256xf32>, i32 -> vector<2x256xf32>
    %c12 = arith.constant 12 : index
    %c0_40 = arith.constant 0 : index
    %c0_41 = arith.constant 0 : index
    %88 = vector.load %arg4[%c12, %c0_40, %c0_41] : memref<49x2x256xf32, #tpu.memory_space<vmem>>, vector<1x2x256xf32>
    %89 = vector.shape_cast %88 : vector<1x2x256xf32> to vector<2x256xf32>
    %90 = arith.mulf %87, %89 : vector<2x256xf32>
    %91 = arith.addf %86, %90 : vector<2x256xf32>
    %c29_i32 = arith.constant 29 : i32
    %92 = tpu.dynamic_rotate %27 by %c29_i32 dim 1 : vector<2x256xf32>, i32 -> vector<2x256xf32>
    %c13 = arith.constant 13 : index
    %c0_42 = arith.constant 0 : index
    %c0_43 = arith.constant 0 : index
    %93 = vector.load %arg4[%c13, %c0_42, %c0_43] : memref<49x2x256xf32, #tpu.memory_space<vmem>>, vector<1x2x256xf32>
    %94 = vector.shape_cast %93 : vector<1x2x256xf32> to vector<2x256xf32>
    %95 = arith.mulf %92, %94 : vector<2x256xf32>
    %96 = arith.addf %91, %95 : vector<2x256xf32>
    %c19_i32 = arith.constant 19 : i32
    %97 = tpu.dynamic_rotate %27 by %c19_i32 dim 1 : vector<2x256xf32>, i32 -> vector<2x256xf32>
    %c14 = arith.constant 14 : index
    %c0_44 = arith.constant 0 : index
    %c0_45 = arith.constant 0 : index
    %98 = vector.load %arg4[%c14, %c0_44, %c0_45] : memref<49x2x256xf32, #tpu.memory_space<vmem>>, vector<1x2x256xf32>
    %99 = vector.shape_cast %98 : vector<1x2x256xf32> to vector<2x256xf32>
    %100 = arith.mulf %97, %99 : vector<2x256xf32>
    %101 = arith.addf %96, %100 : vector<2x256xf32>
    %c18_i32 = arith.constant 18 : i32
    %102 = tpu.dynamic_rotate %27 by %c18_i32 dim 1 : vector<2x256xf32>, i32 -> vector<2x256xf32>
    %c15 = arith.constant 15 : index
    %c0_46 = arith.constant 0 : index
    %c0_47 = arith.constant 0 : index
    %103 = vector.load %arg4[%c15, %c0_46, %c0_47] : memref<49x2x256xf32, #tpu.memory_space<vmem>>, vector<1x2x256xf32>
    %104 = vector.shape_cast %103 : vector<1x2x256xf32> to vector<2x256xf32>
    %105 = arith.mulf %102, %104 : vector<2x256xf32>
    %106 = arith.addf %101, %105 : vector<2x256xf32>
    %c17_i32 = arith.constant 17 : i32
    %107 = tpu.dynamic_rotate %27 by %c17_i32 dim 1 : vector<2x256xf32>, i32 -> vector<2x256xf32>
    %c16 = arith.constant 16 : index
    %c0_48 = arith.constant 0 : index
    %c0_49 = arith.constant 0 : index
    %108 = vector.load %arg4[%c16, %c0_48, %c0_49] : memref<49x2x256xf32, #tpu.memory_space<vmem>>, vector<1x2x256xf32>
    %109 = vector.shape_cast %108 : vector<1x2x256xf32> to vector<2x256xf32>
    %110 = arith.mulf %107, %109 : vector<2x256xf32>
    %111 = arith.addf %106, %110 : vector<2x256xf32>
    %c16_i32 = arith.constant 16 : i32
    %112 = tpu.dynamic_rotate %27 by %c16_i32 dim 1 : vector<2x256xf32>, i32 -> vector<2x256xf32>
    %c17 = arith.constant 17 : index
    %c0_50 = arith.constant 0 : index
    %c0_51 = arith.constant 0 : index
    %113 = vector.load %arg4[%c17, %c0_50, %c0_51] : memref<49x2x256xf32, #tpu.memory_space<vmem>>, vector<1x2x256xf32>
    %114 = vector.shape_cast %113 : vector<1x2x256xf32> to vector<2x256xf32>
    %115 = arith.mulf %112, %114 : vector<2x256xf32>
    %116 = arith.addf %111, %115 : vector<2x256xf32>
    %c15_i32 = arith.constant 15 : i32
    %117 = tpu.dynamic_rotate %27 by %c15_i32 dim 1 : vector<2x256xf32>, i32 -> vector<2x256xf32>
    %c18 = arith.constant 18 : index
    %c0_52 = arith.constant 0 : index
    %c0_53 = arith.constant 0 : index
    %118 = vector.load %arg4[%c18, %c0_52, %c0_53] : memref<49x2x256xf32, #tpu.memory_space<vmem>>, vector<1x2x256xf32>
    %119 = vector.shape_cast %118 : vector<1x2x256xf32> to vector<2x256xf32>
    %120 = arith.mulf %117, %119 : vector<2x256xf32>
    %121 = arith.addf %116, %120 : vector<2x256xf32>
    %c14_i32 = arith.constant 14 : i32
    %122 = tpu.dynamic_rotate %27 by %c14_i32 dim 1 : vector<2x256xf32>, i32 -> vector<2x256xf32>
    %c19 = arith.constant 19 : index
    %c0_54 = arith.constant 0 : index
    %c0_55 = arith.constant 0 : index
    %123 = vector.load %arg4[%c19, %c0_54, %c0_55] : memref<49x2x256xf32, #tpu.memory_space<vmem>>, vector<1x2x256xf32>
    %124 = vector.shape_cast %123 : vector<1x2x256xf32> to vector<2x256xf32>
    %125 = arith.mulf %122, %124 : vector<2x256xf32>
    %126 = arith.addf %121, %125 : vector<2x256xf32>
    %c13_i32 = arith.constant 13 : i32
    %127 = tpu.dynamic_rotate %27 by %c13_i32 dim 1 : vector<2x256xf32>, i32 -> vector<2x256xf32>
    %c20 = arith.constant 20 : index
    %c0_56 = arith.constant 0 : index
    %c0_57 = arith.constant 0 : index
    %128 = vector.load %arg4[%c20, %c0_56, %c0_57] : memref<49x2x256xf32, #tpu.memory_space<vmem>>, vector<1x2x256xf32>
    %129 = vector.shape_cast %128 : vector<1x2x256xf32> to vector<2x256xf32>
    %130 = arith.mulf %127, %129 : vector<2x256xf32>
    %131 = arith.addf %126, %130 : vector<2x256xf32>
    %c3_i32 = arith.constant 3 : i32
    %132 = tpu.dynamic_rotate %27 by %c3_i32 dim 1 : vector<2x256xf32>, i32 -> vector<2x256xf32>
    %c21 = arith.constant 21 : index
    %c0_58 = arith.constant 0 : index
    %c0_59 = arith.constant 0 : index
    %133 = vector.load %arg4[%c21, %c0_58, %c0_59] : memref<49x2x256xf32, #tpu.memory_space<vmem>>, vector<1x2x256xf32>
    %134 = vector.shape_cast %133 : vector<1x2x256xf32> to vector<2x256xf32>
    %135 = arith.mulf %132, %134 : vector<2x256xf32>
    %136 = arith.addf %131, %135 : vector<2x256xf32>
    %c2_i32 = arith.constant 2 : i32
    %137 = tpu.dynamic_rotate %27 by %c2_i32 dim 1 : vector<2x256xf32>, i32 -> vector<2x256xf32>
    %c22 = arith.constant 22 : index
    %c0_60 = arith.constant 0 : index
    %c0_61 = arith.constant 0 : index
    %138 = vector.load %arg4[%c22, %c0_60, %c0_61] : memref<49x2x256xf32, #tpu.memory_space<vmem>>, vector<1x2x256xf32>
    %139 = vector.shape_cast %138 : vector<1x2x256xf32> to vector<2x256xf32>
    %140 = arith.mulf %137, %139 : vector<2x256xf32>
    %141 = arith.addf %136, %140 : vector<2x256xf32>
    %c1_i32 = arith.constant 1 : i32
    %142 = tpu.dynamic_rotate %27 by %c1_i32 dim 1 : vector<2x256xf32>, i32 -> vector<2x256xf32>
    %c23 = arith.constant 23 : index
    %c0_62 = arith.constant 0 : index
    %c0_63 = arith.constant 0 : index
    %143 = vector.load %arg4[%c23, %c0_62, %c0_63] : memref<49x2x256xf32, #tpu.memory_space<vmem>>, vector<1x2x256xf32>
    %144 = vector.shape_cast %143 : vector<1x2x256xf32> to vector<2x256xf32>
    %145 = arith.mulf %142, %144 : vector<2x256xf32>
    %146 = arith.addf %141, %145 : vector<2x256xf32>
    %c24 = arith.constant 24 : index
    %c0_64 = arith.constant 0 : index
    %c0_65 = arith.constant 0 : index
    %147 = vector.load %arg4[%c24, %c0_64, %c0_65] : memref<49x2x256xf32, #tpu.memory_space<vmem>>, vector<1x2x256xf32>
    %148 = vector.shape_cast %147 : vector<1x2x256xf32> to vector<2x256xf32>
    %149 = arith.mulf %27, %148 : vector<2x256xf32>
    %150 = arith.addf %146, %149 : vector<2x256xf32>
    %c255_i32 = arith.constant 255 : i32
    %151 = tpu.dynamic_rotate %27 by %c255_i32 dim 1 : vector<2x256xf32>, i32 -> vector<2x256xf32>
    %c25 = arith.constant 25 : index
    %c0_66 = arith.constant 0 : index
    %c0_67 = arith.constant 0 : index
    %152 = vector.load %arg4[%c25, %c0_66, %c0_67] : memref<49x2x256xf32, #tpu.memory_space<vmem>>, vector<1x2x256xf32>
    %153 = vector.shape_cast %152 : vector<1x2x256xf32> to vector<2x256xf32>
    %154 = arith.mulf %151, %153 : vector<2x256xf32>
    %155 = arith.addf %150, %154 : vector<2x256xf32>
    %c254_i32 = arith.constant 254 : i32
    %156 = tpu.dynamic_rotate %27 by %c254_i32 dim 1 : vector<2x256xf32>, i32 -> vector<2x256xf32>
    %c26 = arith.constant 26 : index
    %c0_68 = arith.constant 0 : index
    %c0_69 = arith.constant 0 : index
    %157 = vector.load %arg4[%c26, %c0_68, %c0_69] : memref<49x2x256xf32, #tpu.memory_space<vmem>>, vector<1x2x256xf32>
    %158 = vector.shape_cast %157 : vector<1x2x256xf32> to vector<2x256xf32>
    %159 = arith.mulf %156, %158 : vector<2x256xf32>
    %160 = arith.addf %155, %159 : vector<2x256xf32>
    %c253_i32 = arith.constant 253 : i32
    %161 = tpu.dynamic_rotate %27 by %c253_i32 dim 1 : vector<2x256xf32>, i32 -> vector<2x256xf32>
    %c27 = arith.constant 27 : index
    %c0_70 = arith.constant 0 : index
    %c0_71 = arith.constant 0 : index
    %162 = vector.load %arg4[%c27, %c0_70, %c0_71] : memref<49x2x256xf32, #tpu.memory_space<vmem>>, vector<1x2x256xf32>
    %163 = vector.shape_cast %162 : vector<1x2x256xf32> to vector<2x256xf32>
    %164 = arith.mulf %161, %163 : vector<2x256xf32>
    %165 = arith.addf %160, %164 : vector<2x256xf32>
    %c243_i32 = arith.constant 243 : i32
    %166 = tpu.dynamic_rotate %27 by %c243_i32 dim 1 : vector<2x256xf32>, i32 -> vector<2x256xf32>
    %c28 = arith.constant 28 : index
    %c0_72 = arith.constant 0 : index
    %c0_73 = arith.constant 0 : index
    %167 = vector.load %arg4[%c28, %c0_72, %c0_73] : memref<49x2x256xf32, #tpu.memory_space<vmem>>, vector<1x2x256xf32>
    %168 = vector.shape_cast %167 : vector<1x2x256xf32> to vector<2x256xf32>
    %169 = arith.mulf %166, %168 : vector<2x256xf32>
    %170 = arith.addf %165, %169 : vector<2x256xf32>
    %c242_i32 = arith.constant 242 : i32
    %171 = tpu.dynamic_rotate %27 by %c242_i32 dim 1 : vector<2x256xf32>, i32 -> vector<2x256xf32>
    %c29 = arith.constant 29 : index
    %c0_74 = arith.constant 0 : index
    %c0_75 = arith.constant 0 : index
    %172 = vector.load %arg4[%c29, %c0_74, %c0_75] : memref<49x2x256xf32, #tpu.memory_space<vmem>>, vector<1x2x256xf32>
    %173 = vector.shape_cast %172 : vector<1x2x256xf32> to vector<2x256xf32>
    %174 = arith.mulf %171, %173 : vector<2x256xf32>
    %175 = arith.addf %170, %174 : vector<2x256xf32>
    %c241_i32 = arith.constant 241 : i32
    %176 = tpu.dynamic_rotate %27 by %c241_i32 dim 1 : vector<2x256xf32>, i32 -> vector<2x256xf32>
    %c30 = arith.constant 30 : index
    %c0_76 = arith.constant 0 : index
    %c0_77 = arith.constant 0 : index
    %177 = vector.load %arg4[%c30, %c0_76, %c0_77] : memref<49x2x256xf32, #tpu.memory_space<vmem>>, vector<1x2x256xf32>
    %178 = vector.shape_cast %177 : vector<1x2x256xf32> to vector<2x256xf32>
    %179 = arith.mulf %176, %178 : vector<2x256xf32>
    %180 = arith.addf %175, %179 : vector<2x256xf32>
    %c240_i32 = arith.constant 240 : i32
    %181 = tpu.dynamic_rotate %27 by %c240_i32 dim 1 : vector<2x256xf32>, i32 -> vector<2x256xf32>
    %c31 = arith.constant 31 : index
    %c0_78 = arith.constant 0 : index
    %c0_79 = arith.constant 0 : index
    %182 = vector.load %arg4[%c31, %c0_78, %c0_79] : memref<49x2x256xf32, #tpu.memory_space<vmem>>, vector<1x2x256xf32>
    %183 = vector.shape_cast %182 : vector<1x2x256xf32> to vector<2x256xf32>
    %184 = arith.mulf %181, %183 : vector<2x256xf32>
    %185 = arith.addf %180, %184 : vector<2x256xf32>
    %c239_i32 = arith.constant 239 : i32
    %186 = tpu.dynamic_rotate %27 by %c239_i32 dim 1 : vector<2x256xf32>, i32 -> vector<2x256xf32>
    %c32 = arith.constant 32 : index
    %c0_80 = arith.constant 0 : index
    %c0_81 = arith.constant 0 : index
    %187 = vector.load %arg4[%c32, %c0_80, %c0_81] : memref<49x2x256xf32, #tpu.memory_space<vmem>>, vector<1x2x256xf32>
    %188 = vector.shape_cast %187 : vector<1x2x256xf32> to vector<2x256xf32>
    %189 = arith.mulf %186, %188 : vector<2x256xf32>
    %190 = arith.addf %185, %189 : vector<2x256xf32>
    %c238_i32 = arith.constant 238 : i32
    %191 = tpu.dynamic_rotate %27 by %c238_i32 dim 1 : vector<2x256xf32>, i32 -> vector<2x256xf32>
    %c33 = arith.constant 33 : index
    %c0_82 = arith.constant 0 : index
    %c0_83 = arith.constant 0 : index
    %192 = vector.load %arg4[%c33, %c0_82, %c0_83] : memref<49x2x256xf32, #tpu.memory_space<vmem>>, vector<1x2x256xf32>
    %193 = vector.shape_cast %192 : vector<1x2x256xf32> to vector<2x256xf32>
    %194 = arith.mulf %191, %193 : vector<2x256xf32>
    %195 = arith.addf %190, %194 : vector<2x256xf32>
    %c237_i32 = arith.constant 237 : i32
    %196 = tpu.dynamic_rotate %27 by %c237_i32 dim 1 : vector<2x256xf32>, i32 -> vector<2x256xf32>
    %c34 = arith.constant 34 : index
    %c0_84 = arith.constant 0 : index
    %c0_85 = arith.constant 0 : index
    %197 = vector.load %arg4[%c34, %c0_84, %c0_85] : memref<49x2x256xf32, #tpu.memory_space<vmem>>, vector<1x2x256xf32>
    %198 = vector.shape_cast %197 : vector<1x2x256xf32> to vector<2x256xf32>
    %199 = arith.mulf %196, %198 : vector<2x256xf32>
    %200 = arith.addf %195, %199 : vector<2x256xf32>
    %c227_i32 = arith.constant 227 : i32
    %201 = tpu.dynamic_rotate %27 by %c227_i32 dim 1 : vector<2x256xf32>, i32 -> vector<2x256xf32>
    %c35 = arith.constant 35 : index
    %c0_86 = arith.constant 0 : index
    %c0_87 = arith.constant 0 : index
    %202 = vector.load %arg4[%c35, %c0_86, %c0_87] : memref<49x2x256xf32, #tpu.memory_space<vmem>>, vector<1x2x256xf32>
    %203 = vector.shape_cast %202 : vector<1x2x256xf32> to vector<2x256xf32>
    %204 = arith.mulf %201, %203 : vector<2x256xf32>
    %205 = arith.addf %200, %204 : vector<2x256xf32>
    %c226_i32 = arith.constant 226 : i32
    %206 = tpu.dynamic_rotate %27 by %c226_i32 dim 1 : vector<2x256xf32>, i32 -> vector<2x256xf32>
    %c36 = arith.constant 36 : index
    %c0_88 = arith.constant 0 : index
    %c0_89 = arith.constant 0 : index
    %207 = vector.load %arg4[%c36, %c0_88, %c0_89] : memref<49x2x256xf32, #tpu.memory_space<vmem>>, vector<1x2x256xf32>
    %208 = vector.shape_cast %207 : vector<1x2x256xf32> to vector<2x256xf32>
    %209 = arith.mulf %206, %208 : vector<2x256xf32>
    %210 = arith.addf %205, %209 : vector<2x256xf32>
    %c225_i32 = arith.constant 225 : i32
    %211 = tpu.dynamic_rotate %27 by %c225_i32 dim 1 : vector<2x256xf32>, i32 -> vector<2x256xf32>
    %c37 = arith.constant 37 : index
    %c0_90 = arith.constant 0 : index
    %c0_91 = arith.constant 0 : index
    %212 = vector.load %arg4[%c37, %c0_90, %c0_91] : memref<49x2x256xf32, #tpu.memory_space<vmem>>, vector<1x2x256xf32>
    %213 = vector.shape_cast %212 : vector<1x2x256xf32> to vector<2x256xf32>
    %214 = arith.mulf %211, %213 : vector<2x256xf32>
    %215 = arith.addf %210, %214 : vector<2x256xf32>
    %c224_i32 = arith.constant 224 : i32
    %216 = tpu.dynamic_rotate %27 by %c224_i32 dim 1 : vector<2x256xf32>, i32 -> vector<2x256xf32>
    %c38 = arith.constant 38 : index
    %c0_92 = arith.constant 0 : index
    %c0_93 = arith.constant 0 : index
    %217 = vector.load %arg4[%c38, %c0_92, %c0_93] : memref<49x2x256xf32, #tpu.memory_space<vmem>>, vector<1x2x256xf32>
    %218 = vector.shape_cast %217 : vector<1x2x256xf32> to vector<2x256xf32>
    %219 = arith.mulf %216, %218 : vector<2x256xf32>
    %220 = arith.addf %215, %219 : vector<2x256xf32>
    %c223_i32 = arith.constant 223 : i32
    %221 = tpu.dynamic_rotate %27 by %c223_i32 dim 1 : vector<2x256xf32>, i32 -> vector<2x256xf32>
    %c39 = arith.constant 39 : index
    %c0_94 = arith.constant 0 : index
    %c0_95 = arith.constant 0 : index
    %222 = vector.load %arg4[%c39, %c0_94, %c0_95] : memref<49x2x256xf32, #tpu.memory_space<vmem>>, vector<1x2x256xf32>
    %223 = vector.shape_cast %222 : vector<1x2x256xf32> to vector<2x256xf32>
    %224 = arith.mulf %221, %223 : vector<2x256xf32>
    %225 = arith.addf %220, %224 : vector<2x256xf32>
    %c222_i32 = arith.constant 222 : i32
    %226 = tpu.dynamic_rotate %27 by %c222_i32 dim 1 : vector<2x256xf32>, i32 -> vector<2x256xf32>
    %c40 = arith.constant 40 : index
    %c0_96 = arith.constant 0 : index
    %c0_97 = arith.constant 0 : index
    %227 = vector.load %arg4[%c40, %c0_96, %c0_97] : memref<49x2x256xf32, #tpu.memory_space<vmem>>, vector<1x2x256xf32>
    %228 = vector.shape_cast %227 : vector<1x2x256xf32> to vector<2x256xf32>
    %229 = arith.mulf %226, %228 : vector<2x256xf32>
    %230 = arith.addf %225, %229 : vector<2x256xf32>
    %c221_i32 = arith.constant 221 : i32
    %231 = tpu.dynamic_rotate %27 by %c221_i32 dim 1 : vector<2x256xf32>, i32 -> vector<2x256xf32>
    %c41 = arith.constant 41 : index
    %c0_98 = arith.constant 0 : index
    %c0_99 = arith.constant 0 : index
    %232 = vector.load %arg4[%c41, %c0_98, %c0_99] : memref<49x2x256xf32, #tpu.memory_space<vmem>>, vector<1x2x256xf32>
    %233 = vector.shape_cast %232 : vector<1x2x256xf32> to vector<2x256xf32>
    %234 = arith.mulf %231, %233 : vector<2x256xf32>
    %235 = arith.addf %230, %234 : vector<2x256xf32>
    %c211_i32 = arith.constant 211 : i32
    %236 = tpu.dynamic_rotate %27 by %c211_i32 dim 1 : vector<2x256xf32>, i32 -> vector<2x256xf32>
    %c42 = arith.constant 42 : index
    %c0_100 = arith.constant 0 : index
    %c0_101 = arith.constant 0 : index
    %237 = vector.load %arg4[%c42, %c0_100, %c0_101] : memref<49x2x256xf32, #tpu.memory_space<vmem>>, vector<1x2x256xf32>
    %238 = vector.shape_cast %237 : vector<1x2x256xf32> to vector<2x256xf32>
    %239 = arith.mulf %236, %238 : vector<2x256xf32>
    %240 = arith.addf %235, %239 : vector<2x256xf32>
    %c210_i32 = arith.constant 210 : i32
    %241 = tpu.dynamic_rotate %27 by %c210_i32 dim 1 : vector<2x256xf32>, i32 -> vector<2x256xf32>
    %c43 = arith.constant 43 : index
    %c0_102 = arith.constant 0 : index
    %c0_103 = arith.constant 0 : index
    %242 = vector.load %arg4[%c43, %c0_102, %c0_103] : memref<49x2x256xf32, #tpu.memory_space<vmem>>, vector<1x2x256xf32>
    %243 = vector.shape_cast %242 : vector<1x2x256xf32> to vector<2x256xf32>
    %244 = arith.mulf %241, %243 : vector<2x256xf32>
    %245 = arith.addf %240, %244 : vector<2x256xf32>
    %c209_i32 = arith.constant 209 : i32
    %246 = tpu.dynamic_rotate %27 by %c209_i32 dim 1 : vector<2x256xf32>, i32 -> vector<2x256xf32>
    %c44 = arith.constant 44 : index
    %c0_104 = arith.constant 0 : index
    %c0_105 = arith.constant 0 : index
    %247 = vector.load %arg4[%c44, %c0_104, %c0_105] : memref<49x2x256xf32, #tpu.memory_space<vmem>>, vector<1x2x256xf32>
    %248 = vector.shape_cast %247 : vector<1x2x256xf32> to vector<2x256xf32>
    %249 = arith.mulf %246, %248 : vector<2x256xf32>
    %250 = arith.addf %245, %249 : vector<2x256xf32>
    %c208_i32 = arith.constant 208 : i32
    %251 = tpu.dynamic_rotate %27 by %c208_i32 dim 1 : vector<2x256xf32>, i32 -> vector<2x256xf32>
    %c45 = arith.constant 45 : index
    %c0_106 = arith.constant 0 : index
    %c0_107 = arith.constant 0 : index
    %252 = vector.load %arg4[%c45, %c0_106, %c0_107] : memref<49x2x256xf32, #tpu.memory_space<vmem>>, vector<1x2x256xf32>
    %253 = vector.shape_cast %252 : vector<1x2x256xf32> to vector<2x256xf32>
    %254 = arith.mulf %251, %253 : vector<2x256xf32>
    %255 = arith.addf %250, %254 : vector<2x256xf32>
    %c207_i32 = arith.constant 207 : i32
    %256 = tpu.dynamic_rotate %27 by %c207_i32 dim 1 : vector<2x256xf32>, i32 -> vector<2x256xf32>
    %c46 = arith.constant 46 : index
    %c0_108 = arith.constant 0 : index
    %c0_109 = arith.constant 0 : index
    %257 = vector.load %arg4[%c46, %c0_108, %c0_109] : memref<49x2x256xf32, #tpu.memory_space<vmem>>, vector<1x2x256xf32>
    %258 = vector.shape_cast %257 : vector<1x2x256xf32> to vector<2x256xf32>
    %259 = arith.mulf %256, %258 : vector<2x256xf32>
    %260 = arith.addf %255, %259 : vector<2x256xf32>
    %c206_i32 = arith.constant 206 : i32
    %261 = tpu.dynamic_rotate %27 by %c206_i32 dim 1 : vector<2x256xf32>, i32 -> vector<2x256xf32>
    %c47 = arith.constant 47 : index
    %c0_110 = arith.constant 0 : index
    %c0_111 = arith.constant 0 : index
    %262 = vector.load %arg4[%c47, %c0_110, %c0_111] : memref<49x2x256xf32, #tpu.memory_space<vmem>>, vector<1x2x256xf32>
    %263 = vector.shape_cast %262 : vector<1x2x256xf32> to vector<2x256xf32>
    %264 = arith.mulf %261, %263 : vector<2x256xf32>
    %265 = arith.addf %260, %264 : vector<2x256xf32>
    %c205_i32 = arith.constant 205 : i32
    %266 = tpu.dynamic_rotate %27 by %c205_i32 dim 1 : vector<2x256xf32>, i32 -> vector<2x256xf32>
    %c48 = arith.constant 48 : index
    %c0_112 = arith.constant 0 : index
    %c0_113 = arith.constant 0 : index
    %267 = vector.load %arg4[%c48, %c0_112, %c0_113] : memref<49x2x256xf32, #tpu.memory_space<vmem>>, vector<1x2x256xf32>
    %268 = vector.shape_cast %267 : vector<1x2x256xf32> to vector<2x256xf32>
    %269 = arith.mulf %266, %268 : vector<2x256xf32>
    %270 = arith.addf %265, %269 : vector<2x256xf32>
    %271 = vector.extract_strided_slice %270 {offsets = [0, 0], sizes = [1, 256], strides = [1, 1]} : vector<2x256xf32> to vector<1x256xf32>
    %272 = vector.extract_strided_slice %270 {offsets = [1, 0], sizes = [1, 256], strides = [1, 1]} : vector<2x256xf32> to vector<1x256xf32>
    %273 = arith.addf %271, %272 : vector<1x256xf32>
    %274 = arith.negf %273 : vector<1x256xf32>
    %275 = math.exp %274 : vector<1x256xf32>
    %cst_114 = arith.constant 1.000000e+00 : f32
    %276 = vector.broadcast %cst_114 : f32 to vector<1x256xf32>
    %277 = arith.addf %276, %275 : vector<1x256xf32>
    %278 = arith.divf %276, %277 : vector<1x256xf32>
    %279 = vector.shape_cast %278 : vector<1x256xf32> to vector<1x1x256xf32>
    %280 = vector.broadcast %279 : vector<1x1x256xf32> to vector<1x32x256xf32>
    %281 = arith.mulf %22, %280 : vector<1x32x256xf32>
    %c0_115 = arith.constant 0 : index
    %c0_116 = arith.constant 0 : index
    %c0_117 = arith.constant 0 : index
    %282 = vector.load %arg5[%c0_115, %c0_116, %c0_117] : memref<1x32x256xf32, #tpu.memory_space<vmem>>, vector<1x32x256xf32>
    tpu.vector_store %arg5[%c0_115, %c0_116, %c0_117], %281 {strides = array<i32>} : memref<1x32x256xf32, #tpu.memory_space<vmem>>, vector<1x32x256xf32>,
    return
  }
  func.func @transform_0(%arg0: i32) -> (i32, i32, i32) {
    %c0_i32 = arith.constant 0 : i32
    %c0_i32_0 = arith.constant 0 : i32
    %c0_i32_1 = arith.constant 0 : i32
    return %arg0, %c0_i32, %c0_i32_0 : i32, i32, i32
  }
  func.func @transform_1(%arg0: i32) -> (i32, i32) {
    %c0_i32 = arith.constant 0 : i32
    %c0_i32_0 = arith.constant 0 : i32
    %c0_i32_1 = arith.constant 0 : i32
    return %c0_i32, %c0_i32_0 : i32, i32
  }
  func.func @transform_2(%arg0: i32) -> (i32, i32) {
    %c0_i32 = arith.constant 0 : i32
    %c0_i32_0 = arith.constant 0 : i32
    %c0_i32_1 = arith.constant 0 : i32
    return %c0_i32, %c0_i32_0 : i32, i32
  }
  func.func @transform_3(%arg0: i32) -> (i32, i32, i32) {
    %c0_i32 = arith.constant 0 : i32
    %c0_i32_0 = arith.constant 0 : i32
    %c0_i32_1 = arith.constant 0 : i32
    %c0_i32_2 = arith.constant 0 : i32
    return %c0_i32, %c0_i32_0, %c0_i32_1 : i32, i32, i32
  }
  func.func @transform_4(%arg0: i32) -> (i32, i32, i32) {
    %c0_i32 = arith.constant 0 : i32
    %c0_i32_0 = arith.constant 0 : i32
    %c0_i32_1 = arith.constant 0 : i32
    return %arg0, %c0_i32, %c0_i32_0 : i32, i32, i32
  }
}

</mosaic_0001>

<bundles_post_ra>
// kernel: tpu_custom_call.1
= control target key start
LH: loop header
LB: loop body
LE: loop exit
PB: predicated region body
PF: predicated region fallthrough
CT: control target
= control target key end

     0   :  { %9 = vsyncpa [#allocation3], 0  ;;  %s2987_s0 = inlined_call_operand.hbm [shape: f32[2,32,256], index: 0, kind: input, shape index: {}]   ;;  %s2988_s1 = inlined_call_operand.vmem [shape: f32[32,2], index: 1, kind: input, shape index: {}]   ;;  %s2989_s2 = inlined_call_operand.vmem [shape: f32[2,32], index: 2, kind: input, shape index: {}]   ;;  %s2990_s3 = inlined_call_operand.hbm [shape: f32[49,2,256], index: 3, kind: input, shape index: {}]   ;;  %s2991_s4 = inlined_call_operand.hbm [shape: f32[2,32,256], index: 4, kind: output, shape index: {}]  }
   0x1   :  { %11 = vsyncpa [#allocation3 + $0x1], 0 }
   0x2   :  { %12 = vsyncpa [#allocation6], 0 }
   0x3   :  { %13 = vsyncpa [#allocation4], 0 }
   0x4   :  { %15 = vsyncpa [#allocation4 + $0x1], 0  ;;  %s2294_s15 = smov 0   ;;  %s2296_s16 = smov 0  }
   0x5   :  { %s2298_s17 = smov 0   ;;  %s2300_s18 = smov 0  }
   0x6 LB: > { %s2315_s19 = sadd.s32 4294967295, %s2209_s18   ;;  %s1867_s20 = sadd.s32 4294967294, %s2209_s18   ;;  %s2209_s18 = sphi %s2300_s18, %s3025_s18   ;;  %s2205_s17 = sphi %s2298_s17, %s3024_s17   ;;  %s2201_s16 = sphi %s2296_s16, %s3023_s16   ;;  %s2197_s15 = sphi %s2294_s15, %s3022_s15  }
   0x7   : > { %p41_p0 = scmp.ne.s32.totalorder %s2201_s16, %s2197_s15  ;;  %p2992_p1 = scmp.eq.s32.totalorder %s2315_s19, 0 }
   0x8   : > { %p134_p3 = scmp.eq.s32.totalorder %s1867_s20, 1  ;;  %p1868_p5 = scmp.ge.s32.totalorder %s2209_s18, 1 }
   0x9   : > { %p2324_p4 = por %p2992_p1, %p41_p0  ;;  %p141_p7 = scmp.lt.s32.totalorder %s2209_s18, 3 }
   0xa   : > { %p2329_p6 = por %p134_p3, %p41_p0  ;;  %s2211_s24 = smov [#allocation5]  }
   0xb   : > { %s3000_s21 = scalar_select %p2324_p4, 1, 0 }
   0xc   : > { %s3001_s22 = scalar_select %p2329_p6, 1, 0 }
   0xd   : > { %p2334_p8 = pnand %p1868_p5, %p141_p7  ;;  %s159_s25 = sshll.u32 %s2211_s24, 4  ;;  %s160_s25 = int_to_ptr.vmem [resolvable:$true] %s159_s25 }
   0xe   : > { %s2348_s27 = sadd.s32 1, %s2209_s18   ;;  %s28_s28 = sadd.s32 1, %s2205_s17 }
   0xf   : > { %s3002_s23 = scalar_select %p2334_p8, 1, 0 }
  0x10   : > { %p1971_p9 = pneg %p2334_p8  ;;  %s25_s29 = ssub.s32 %s2209_s18, %s2348_s27 }
  0x11   : > { %s2098_s30 = scalar_lea.vmem %s160_s25, 3136  ;;  %p2106_p5 = scmp.lt.s32.totalorder %s160_s25, %s160_s25 }
  0x12   : > { %p2343_p11 = pnand %p1971_p9, %p2992_p1  ;;  %p2099_p13 = scmp.ne.s32.totalorder %s160_s25, %s2098_s30 }
  0x13   : > { %p2107_p7 = scmp.lt.s32.totalorder %s2098_s30, %s2098_s30 }
  0x14   : > { %p2089_p12 = pneg %p2343_p11 }
  0x15   : > { %p2108_p10 = por %p2107_p7, %p2106_p5 }
  0x16   : > { %p2101_p0 = pnand %p2099_p13, %p2089_p12 }
  0x18   : > { %p2102_p3 = pneg %p2101_p0 }
  0x1a   : > { %p2109_p2 = pnand %p2108_p10, %p2102_p3 }
  0x1c   : > { %2112 = shalt.err (!%p2109_p2)
}
  0x1d   : > { %s2212_s5 = smov 64   ;;  %s2213_s6 = smov 4  }
  0x1e   : > { %1974 = dma.hbm_to_vmem [thread:$0]  (!%p2343_p11), %s2990_s3, 3136, %s160_s25, [#allocation6], %s2212_s5, %s2212_s5, %s2213_s6  }
  0x1f   : > { %p26_p9 = scmp.eq.s32.totalorder %s25_s29, 0  ;;  %p35_p12 = scmp.ne.s32.totalorder %s2205_s17, %s2201_s16 }
  0x20   : > { %p36_p10 = scmp.eq.s32.totalorder %s2209_s18, 0  ;;  %p1984_p2 = scmp.lt.s32.totalorder %s2209_s18, 2 }
  0x21   : > { %s2365_s9 = scalar_select %p26_p9, %s2205_s17, %s28_s28  }
  0x22   : > { %p37_p13 = por %p36_p10, %p35_p12  ;;  %p3004_p0 = scmp.eq.s32.totalorder %s2315_s19, 1 }
  0x23   : > { %s173_s11 = sand.u32 1, %s2205_s17   ;;  %s1938_s12 = sshll.u32 %s2209_s18, 10 }
  0x24   : > { %p2369_p3 = por %p3004_p0, %p35_p12  ;;  %s1871_s13 = sshll.u32 %s173_s11, 6 }
  0x25   : > { %s2378_s24 = scalar_lea.hbm %s2987_s0, %s1938_s12  ;;  %s177_s25 = scalar_lea.vmem [#allocation2], %s1871_s13 }
  0x26   : > { %s3005_s10 = scalar_select %p2369_p3, 1, 0 }
  0x27   : > { %s184_s26 = sshll.u32 %s177_s25, 4  ;;  %p2380_p11 = pnand %p1984_p2, %p37_p13  ;;  %s2384_s26 = int_to_ptr.vmem [resolvable:$true] %s184_s26 }
  0x28   : > { %s2386_s29 = scalar_lea.sflag [#allocation3], %s173_s11  ;;  %s2113_s30 = scalar_lea.hbm %s2378_s24, 1024 }
  0x29   : > { %p2114_p5 = scmp.ne.s32.totalorder %s2378_s24, %s2113_s30  ;;  %p2115_p7 = pneg %p2380_p11 }
  0x2a   : > { %s2118_s7 = scalar_lea.hbm %s2987_s0, 2048  ;;  %p2119_p10 = scmp.lt.s32.totalorder %s2378_s24, %s2987_s0 }
  0x2b   : > { %p2116_p9 = pnand %p2115_p7, %p2114_p5  ;;  %p2120_p2 = scmp.lt.s32.totalorder %s2118_s7, %s2113_s30 }
  0x2d   : > { %p2117_p12 = pneg %p2116_p9  ;;  %p2121_p13 = por %p2120_p2, %p2119_p10 }
  0x2f   : > { %p2122_p0 = pnand %p2121_p13, %p2117_p12 }
  0x31   : > { %2125 = shalt.err (!%p2122_p0)
}
  0x32   : > { %s2126_s11 = scalar_lea.vmem %s2384_s26, 1024  ;;  %s2214_s13 = smov [#allocation2]  }
  0x33   : > { %p2127_p1 = scmp.ne.s32.totalorder %s2384_s26, %s2126_s11  ;;  %s2131_s14 = sshll.u32 %s2214_s13, 4  ;;  %s2132_s14 = int_to_ptr.vmem [resolvable:$false] %s2131_s14 }
  0x34   : > { %s2133_s20 = scalar_lea.vmem %s2132_s14, 2048  ;;  %p2134_p9 = scmp.lt.s32.totalorder %s2384_s26, %s2132_s14 }
  0x35   : > { %p2129_p6 = pnand %p2127_p1, %p2115_p7  ;;  %p2135_p3 = scmp.lt.s32.totalorder %s2133_s20, %s2126_s11 }
  0x37   : > { %p2130_p5 = pneg %p2129_p6  ;;  %p2136_p4 = por %p2135_p3, %p2134_p9 }
  0x39   : > { %p2137_p8 = pnand %p2136_p4, %p2130_p5 }
  0x3b   : > { %2140 = shalt.err (!%p2137_p8)
}
  0x3c   : > { %s2215_s25 = smov 256   ;;  %s2216_s30 = smov 16  }
  0x3d   : > { %1978 = dma.hbm_to_vmem [thread:$0]  (!%p2380_p11), %s2378_s24, 1024, %s2384_s26, %s2386_s29, %s2215_s25, %s2215_s25, %s2216_s30  }
  0x3e   : > { %p3007_p1 = scmp.ne.s32.totalorder %s3002_s23, 0 }
  0x40   : > { %196 = sbr.rel (%p3007_p1) target bundleno = 1168 (0x490), region = 36 }
  0x45   : > { %s2410_s5 = sand.u32 1, %s2201_s16   ;;  %p3008_p4 = scmp.ne.s32.totalorder %s3000_s21, 0 }
  0x46   : > { %s1875_s6 = sshll.u32 %s2410_s5, 6  ;;  %s199_s7 = scalar_lea.sflag [#allocation3], %s2410_s5 }
  0x47   : > { %s202_s8 = scalar_lea.vmem [#allocation2], %s1875_s6 }
  0x48   : > { %2184 = dma.done.wait (%p3008_p4), %s199_s7, 1024  }
  0x49   : > { %2186 = vsyncadd (%p3008_p4), %s199_s7, 4294966272  ;;  %p3009_p6 = scmp.eq.s32.totalorder %s2315_s19, 0 }
  0x4b   : > { %2188 = dma.done.wait (%p3009_p6), [#allocation6], 3136   ;;  %p3010_p8 = pmov %p3009_p6 }
  0x4c   : > { %v2424_v0 = vld [vmem:[%s202_s8 + $0x20] sm:$0xff]  ;;  %v2426_v1 = vld [vmem:[%s202_s8 + $0x28] sm:$0xff]  ;;  %v2434_v5 = vld [vmem:[%s202_s8 + $0x10] sm:$0xff]  ;;  %v2217_v16 = vmov 0.0   ;;  %vm2218_vm0 = vmmov 0   ;;  %v271_v21 = vlaneseq  ;;  %vm282_vm1 = vcmask 130112  }
  0x4d   : > { %2190 = vsyncadd (%p3010_p8), [#allocation6], 4294964160  ;;  %v2428_v2 = vld [vmem:[%s202_s8] sm:$0xff]  ;;  %v257_v3 = vadd.f32 %v2426_v1, %v2424_v0  ;;  %v2432_v4 = vld [vmem:[%s202_s8 + $0x8] sm:$0xff]  ;;  %v245_v15 = vmax.f32 %v2424_v0, %v2426_v1  ;;  %1947 = vmatprep.subr.mxu0 %v2217_v16  ;;  %1958 = vmatprep.subr.mxu1 %v2217_v16  ;;  %vm289_vm2 = vcmask 195712   ;;  %vm296_vm3 = vcmask 261312  }
  0x4e   : > { %v2436_v6 = vld [vmem:[%s202_s8 + $0x18] sm:$0xff]  ;;  %v251_v7 = vadd.f32 %v2432_v4, %v2428_v2  ;;  %v239_v8 = vmax.f32 %v2428_v2, %v2432_v4  ;;  %v2444_v10 = vld [vmem:[%s202_s8 + $0x30] sm:$0xff]  ;;  %v326_v19 = vld [vmem:[%s2988_s1 + $0x8] sm:$0xff]  ;;  %1955 = vmatprep.mubr.msk.f32.mxu0 %vm2218_vm0, %v2217_v16  ;;  %1960 = vmatprep.mubr.msk.f32.mxu1 %vm2218_vm0, %v2217_v16  ;;  %v2468_v22 = vand.u32 127, %v271_v21  ;;  %v274_v26 = vshrl.u32 %v271_v21, 7  ;;  %s2219_s20 = smov 51  }
  0x4f   : > { %258 = vadd.xlane.f32.xlu1 %v257_v3  ;;  %v254_v9 = vadd.f32 %v2436_v6, %v2434_v5  ;;  %v2446_v11 = vld [vmem:[%s202_s8 + $0x38] sm:$0xff]  ;;  %v242_v13 = vmax.f32 %v2434_v5, %v2436_v6  ;;  %v327_v18 = vld [vmem:[%s2988_s1 + $0x10] sm:$0xff]  ;;  %v325_v20 = vld [vmem:[%s2988_s1] sm:$0xff]  ;;  %vm323_vm4 = vcmask 1040384   ;;  %vm329_vm5 = vcmask 261120   ;;  %s2220_s25 = smov 50  }
  0x50   : > { %252 = vadd.xlane.f32.xlu0 %v251_v7  ;;  %v260_v12 = vadd.f32 %v2446_v11, %v2444_v10  ;;  %v248_v14 = vmax.f32 %v2444_v10, %v2446_v11  ;;  %v328_v17 = vld [vmem:[%s2988_s1 + $0x18] sm:$0xff]  ;;  %v277_v25 = vadd.s32 4294967288, %v2468_v22  ;;  %v291_v30 = vadd.s32 4294967272, %v2468_v22  ;;  %v404_v58 = vld [vmem:[%s2989_s2] sm:$0x3]  ;;  %s2221_s30 = smov 49  }
  0x51   : > { %1948 = vmatpush3.msra.mxu0 %v328_v17  ;;  %v284_v31 = vadd.s32 4294967280, %v2468_v22  ;;  %v275_v33 = vsub.s32 %v2468_v22, %v274_v26  ;;  %vm409_vm6 = vcmask 1041408   ;;  %vm405_vm7 = vcmask 15360   ;;  %s2222_s7 = smov 48   ;;  %s2223_s8 = smov 47  }
  0x52   : > { %1949 = vmatprep.subr.mxu0 %v2217_v16  ;;  %v280_v28 = vsub.s32 %v277_v25, %v274_v26  ;;  %v294_v38 = vsub.s32 %v291_v30, %v274_v26  ;;  %1959 = vmatpush3.msk.msra.mxu1 %vm409_vm6, %v404_v58  ;;  %s2224_s21 = smov 46   ;;  %s2225_s23 = smov 45   ;;  %vm564_vm8 = vcmp.lt.s32.totalorder %v2468_v22, 51  ;;  %vm585_vm9 = vcmp.lt.s32.totalorder %v2468_v22, 50 }
  0x53   : > { %240 = vmax.xlane.f32.xlu1 %v239_v8  ;;  %1950 = vmatpush3.msra.mxu0 %v327_v18  ;;  %v287_v40 = vsub.s32 %v284_v31, %v274_v26  ;;  %s2226_s24 = smov 35   ;;  %s2227_s26 = smov 34   ;;  %vm609_vm10 = vcmp.lt.s32.totalorder %v2468_v22, 49  ;;  %vm633_vm11 = vcmp.lt.s32.totalorder %v2468_v22, 48  ;;  %vm657_vm12 = vcmp.lt.s32.totalorder %v2468_v22, 47 }
  0x54   : > { %255 = vadd.xlane.f32.xlu0 %v254_v9  ;;  %1951 = vmatprep.subr.mxu0 %v2217_v16  ;;  %s2228_s28 = smov 33   ;;  %s2229_s29 = smov 32   ;;  %vm681_vm13 = vcmp.lt.s32.totalorder %v2468_v22, 46  ;;  %vm705_vm14 = vcmp.lt.s32.totalorder %v2468_v22, 45  ;;  %vm729_vm15 = vcmp.lt.s32.totalorder %v2468_v22, 35  ;;  %vm753_vm0 = vcmp.lt.s32.totalorder %v2468_v22, 34 }
  0x55   : > { %1952 = vmatpush3.msra.mxu0 %v326_v19  ;;  %s2230_s12 = smov 31   ;;  %s2231_s11 = smov 30   ;;  %vm897_vm6 = vcmp.lt.s32.totalorder %v2468_v22, 19 }
  0x56   : > { %1953 = vmatprep.subr.mxu0 %v2217_v16  ;;  %s2232_s13 = smov 29   ;;  %s2233_s14 = smov 19  }
  0x57   : > { %261 = vadd.xlane.f32.xlu1 %v260_v12  ;;  %1954 = vmatpush3.msra.mxu0 %v325_v20  ;;  %p3019_p11 = scmp.ne.s32.totalorder %s3005_s10, 0 }
  0x58   : > { %243 = vmax.xlane.f32.xlu0 %v242_v13  ;;  %v2478_v13 = vsub.s32 0, %v274_v26 }
  0x5b   : > { %249 = vmax.xlane.f32.xlu1 %v248_v14 }
  0x5c   : > { %246 = vmax.xlane.f32.xlu0 %v245_v15 }
  0xd8   : > { %v259_v23 = vpop.xlane.xlu1 %258 }
  0xd9   : > { %v253_v24 = vpop.xlane.xlu0 %252  ;;  %v265_v41 = vmul.f32 0.00390625, %v259_v23 }
  0xda   : > { %v263_v34 = vmul.f32 0.00390625, %v253_v24 }
  0xdb   : > { %v315_v50 = vrot.slane %v265_v41, %v287_v40 }
  0xdc   : > { %v241_v27 = vpop.xlane.xlu1 %240  ;;  %v306_v42 = vrot.slane %v263_v34, %v275_v33 }
  0xdd   : > { %v256_v29 = vpop.xlane.xlu0 %255  ;;  %v276_v46 = vrot.slane %v241_v27, %v275_v33 }
  0xde   : > { %v264_v32 = vmul.f32 0.00390625, %v256_v29 }
  0xe0   : > { %v262_v35 = vpop.xlane.xlu1 %261  ;;  %v310_v36 = vrot.slane %v264_v32, %v280_v28 }
  0xe1   : > { %v244_v37 = vpop.xlane.xlu0 %243  ;;  %v266_v39 = vmul.f32 0.00390625, %v262_v35 }
  0xe2   : > { %v281_v43 = vrot.slane %v244_v37, %v280_v28  ;;  %v311_v45 = vsel %vm282_vm1, %v310_v36, %v306_v42 }
  0xe3   : > { %v320_v47 = vrot.slane %v266_v39, %v294_v38  ;;  %v316_v54 = vsel %vm289_vm2, %v315_v50, %v311_v45 }
  0xe4   : > { %v250_v44 = vpop.xlane.xlu1 %249  ;;  %v283_v52 = vsel %vm282_vm1, %v281_v43, %v276_v46  ;;  %vm777_vm1 = vcmp.lt.s32.totalorder %v2468_v22, 33 }
  0xe5   : > { %v247_v48 = vpop.xlane.xlu0 %246  ;;  %v295_v49 = vrot.slane %v250_v44, %v294_v38  ;;  %v321_v56 = vsel %vm296_vm3, %v320_v47, %v316_v54 }
  0xe6   : > { %v288_v51 = vrot.slane %v247_v48, %v287_v40 }
  0xe8   : > { %v290_v53 = vsel %vm289_vm2, %v288_v51, %v283_v52  ;;  %vm801_vm2 = vcmp.lt.s32.totalorder %v2468_v22, 32 }
  0xe9   : > { %v297_v55 = vsel %vm296_vm3, %v295_v49, %v290_v53  ;;  %vm825_vm3 = vcmp.lt.s32.totalorder %v2468_v22, 31 }
  0xea   : > { %v324_v57 = vsel %vm323_vm4, %v297_v55, %v321_v56 }
  0xeb   : > { %1956 = vmatmul.mubr.msk.f32.vlgmr.msra.gmra.mxu0 %vm329_vm5, %v324_v57  ;;  %vm873_vm5 = vcmp.lt.s32.totalorder %v2468_v22, 29 }
 0x1ab   : > { %v399_v59 = vpop.f32.mrf.mxu0 }
 0x1ac   : > { %v403_v60 = vmax.f32 %v399_v59, 0.0 }
 0x1ad   : > { %v1957_v61 = vpop.f32.mrf.mxu0 }
 0x1ae   : > { %1961 = vmatmul.mubr.msk.f32.vlgmr.msra.gmra.mxu1 %vm405_vm7, %v403_v60  ;;  %v1882_v61 = vld.sshfl [vmem:[#allocation5] sm:$0x33 pattern:$0x76325410]  ;;  %vm921_vm7 = vcmp.lt.s32.totalorder %v2468_v22, 18 }
 0x26e   : > { %v479_v62 = vpop.f32.mrf.mxu1 }
 0x26f   : > { %v484_v63 = vrot.slane %v479_v62, 1 }
 0x270   : > { %v1962_v3 = vpop.f32.mrf.mxu1 }
 0x271   : > { %v486_v7 = vadd.f32 %v484_v63, %v479_v62  ;;  %v1883_v62 = vld.sshfl [vmem:[#allocation5 + $0x4] sm:$0x33 pattern:$0x76325410] }
 0x273   : > { %v1881_v8 = vmul.f32 -1.442695, %v486_v7 }
 0x275   : > { %2075 = vpow2.f32 %v1881_v8 }
 0x282   : > { %v2076_v9 = vpop.eup %2075 }
 0x283   : > { %v490_v12 = vadd.f32 1.0, %v2076_v9  ;;  %v576_v9 = vcombine.high %v1882_v61, %v1882_v61 }
 0x285   : > { %2077 = vrcp.f32 %v490_v12  ;;  %v598_v12 = vcombine.high %v1883_v62, %v1883_v62 }
 0x292   : > { %v2078_v14 = vpop.eup %2077 }
 0x293   : > { %v496_v15 = vrot.slane %v2078_v14, %v2478_v13  ;;  %v1884_v14 = vld.sshfl [vmem:[#allocation5 + $0x8] sm:$0x33 pattern:$0x76325410] }
 0x295   : > { %502 = vbcast.lane.b32.xlu1 %v496_v15, 264  ;;  %498 = vbcast.lane.b32.xlu0 %v496_v15, 256 }
 0x299   : > { %506 = vbcast.lane.b32.xlu1 %v496_v15, 272 }
 0x29d   : > { %510 = vbcast.lane.b32.xlu1 %v496_v15, 280 }
 0x307   : > { %v503_v16 = vpop.permute.xlu1 %502  ;;  %v499_v17 = vpop.permute.xlu0 %498 }
 0x308   : > { %v2482_v18 = vmul.f32 %v503_v16, %v2434_v5  ;;  %v2485_v19 = vmul.f32 %v503_v16, %v2436_v6  ;;  %v2488_v20 = vmul.f32 %v499_v17, %v2428_v2  ;;  %v2491_v21 = vmul.f32 %v499_v17, %v2432_v4 }
 0x30a   : > { %3011 = vst [vmem:[#allocation11_spill] sm:$0xff] %v2485_v19  ;;  %3012 = vst [vmem:[#allocation12_spill] sm:$0xff] %v2491_v21  ;;  %v538_v5 = vadd.f32 %v2482_v18, %v2488_v20  ;;  %v547_v6 = vadd.f32 %v2485_v19, %v2491_v21 }
 0x30b   : > { %v507_v23 = vpop.permute.xlu1 %506 }
 0x30c   : > { %v2494_v24 = vmul.f32 %v507_v23, %v2424_v0  ;;  %v2497_v25 = vmul.f32 %v507_v23, %v2426_v1 }
 0x30e   : > { %3013 = vst [vmem:[#allocation13_spill] sm:$0xff] %v2497_v25  ;;  %v539_v2 = vadd.f32 %v538_v5, %v2494_v24  ;;  %v548_v27 = vadd.f32 %v547_v6, %v2497_v25  ;;  %v520_v1 = vmax.f32 %v2488_v20, %v2494_v24  ;;  %v529_v28 = vmax.f32 %v2491_v21, %v2497_v25 }
 0x30f   : > { %v511_v26 = vpop.permute.xlu1 %510  ;;  %v622_v6 = vcombine.high %v1884_v14, %v1884_v14 }
 0x310   : > { %v2506_v4 = vmul.f32 %v511_v26, %v2444_v10  ;;  %v2509_v0 = vmul.f32 %v511_v26, %v2446_v11 }
 0x312   : > { %3014 = vst [vmem:[#allocation14_spill] sm:$0xff] %v2509_v0  ;;  %v521_v29 = vmax.f32 %v2482_v18, %v2506_v4  ;;  %v530_v30 = vmax.f32 %v2485_v19, %v2509_v0  ;;  %v540_v31 = vadd.f32 %v539_v2, %v2506_v4  ;;  %v549_v10 = vadd.f32 %v548_v27, %v2509_v0 }
 0x314   : > { %v522_v32 = vmax.f32 %v520_v1, %v521_v29  ;;  %v531_v33 = vmax.f32 %v529_v28, %v530_v30  ;;  %v541_v11 = vrot.slane %v540_v31, 4  ;;  %v550_v34 = vrot.slane %v549_v10, 4  ;;  %v1885_v1 = vld.sshfl [vmem:[#allocation5 + $0xc] sm:$0x33 pattern:$0x76325410] }
 0x316   : > { %v523_v35 = vrot.slane %v522_v32, 4  ;;  %v532_v36 = vrot.slane %v531_v33, 4  ;;  %v542_v37 = vadd.f32 %v541_v11, %v540_v31  ;;  %v551_v38 = vadd.f32 %v550_v34, %v549_v10 }
 0x317   : > { %v646_v34 = vcombine.high %v1885_v1, %v1885_v1 }
 0x318   : > { %v524_v39 = vmax.f32 %v522_v32, %v523_v35  ;;  %v533_v40 = vmax.f32 %v531_v33, %v532_v36  ;;  %v543_v41 = vrot.slane %v542_v37, 2  ;;  %v552_v42 = vrot.slane %v551_v38, 2  ;;  %v1886_v35 = vld.sshfl [vmem:[#allocation5 + $0x10] sm:$0x33 pattern:$0x76325410] }
 0x31a   : > { %v525_v43 = vrot.slane %v524_v39, 2  ;;  %v534_v44 = vrot.slane %v533_v40, 2  ;;  %v544_v45 = vadd.f32 %v543_v41, %v542_v37  ;;  %v553_v46 = vadd.f32 %v552_v42, %v551_v38 }
 0x31c   : > { %v526_v47 = vmax.f32 %v524_v39, %v525_v43  ;;  %v535_v48 = vmax.f32 %v533_v40, %v534_v44  ;;  %v545_v49 = vrot.slane %v544_v45, 1  ;;  %v554_v50 = vrot.slane %v553_v46, 1 }
 0x31d   : > { %v670_v44 = vcombine.high %v1886_v35, %v1886_v35 }
 0x31e   : > { %v527_v51 = vrot.slane %v526_v47, 1  ;;  %v536_v52 = vrot.slane %v535_v48, 1  ;;  %v546_v53 = vadd.f32 %v545_v49, %v544_v45  ;;  %v555_v54 = vadd.f32 %v554_v50, %v553_v46  ;;  %v1887_v45 = vld.sshfl [vmem:[#allocation5 + $0x14] sm:$0x33 pattern:$0x76325410] }
 0x320   : > { %v528_v55 = vmax.f32 %v526_v47, %v527_v51  ;;  %v537_v56 = vmax.f32 %v535_v48, %v536_v52  ;;  %v556_v57 = vmul.f32 0.03125, %v546_v53  ;;  %v557_v58 = vmul.f32 0.03125, %v555_v54 }
 0x321   : > { %v694_v54 = vcombine.high %v1887_v45, %v1887_v45 }
 0x322   : > { %v2522_v59 = vsel %vm323_vm4, %v528_v55, %v556_v57  ;;  %v2525_v60 = vsel %vm323_vm4, %v537_v56, %v557_v58  ;;  %v1888_v55 = vld.sshfl [vmem:[#allocation5 + $0x18] sm:$0x33 pattern:$0x76325410]  ;;  %vm849_vm4 = vcmp.lt.s32.totalorder %v2468_v22, 30 }
 0x323   : > { %562 = vrot.lane.b32.xlu1 %v2525_v60, %s2219_s20  ;;  %560 = vrot.lane.b32.xlu0 %v2522_v59, %s2219_s20  ;;  %s2234_s20 = smov 18  }
 0x327   : > { %583 = vrot.lane.b32.xlu1 %v2525_v60, %s2220_s25  ;;  %581 = vrot.lane.b32.xlu0 %v2522_v59, %s2220_s25  ;;  %s2235_s25 = smov 17  }
 0x32b   : > { %607 = vrot.lane.b32.xlu1 %v2525_v60, %s2221_s30  ;;  %605 = vrot.lane.b32.xlu0 %v2522_v59, %s2221_s30  ;;  %s2236_s30 = smov 16  }
 0x32f   : > { %631 = vrot.lane.b32.xlu1 %v2525_v60, %s2222_s7  ;;  %629 = vrot.lane.b32.xlu0 %v2522_v59, %s2222_s7  ;;  %s2237_s7 = smov 15  }
 0x333   : > { %655 = vrot.lane.b32.xlu1 %v2525_v60, %s2223_s8  ;;  %653 = vrot.lane.b32.xlu0 %v2522_v59, %s2223_s8  ;;  %s2238_s8 = smov 14  }
 0x337   : > { %679 = vrot.lane.b32.xlu1 %v2525_v60, %s2224_s21  ;;  %677 = vrot.lane.b32.xlu0 %v2522_v59, %s2224_s21  ;;  %s2239_s21 = smov 13  }
 0x33b   : > { %703 = vrot.lane.b32.xlu1 %v2525_v60, %s2225_s23  ;;  %701 = vrot.lane.b32.xlu0 %v2522_v59, %s2225_s23  ;;  %s2240_s23 = smov 3  }
 0x33f   : > { %727 = vrot.lane.b32.xlu1 %v2525_v60, %s2226_s24  ;;  %725 = vrot.lane.b32.xlu0 %v2522_v59, %s2226_s24  ;;  %s2241_s24 = smov 2  }
 0x343   : > { %751 = vrot.lane.b32.xlu1 %v2525_v60, %s2227_s26  ;;  %749 = vrot.lane.b32.xlu0 %v2522_v59, %s2227_s26  ;;  %s2242_s26 = smov 1  }
 0x347   : > { %775 = vrot.lane.b32.xlu1 %v2525_v60, %s2228_s28  ;;  %773 = vrot.lane.b32.xlu0 %v2522_v59, %s2228_s28  ;;  %s2243_s28 = smov 127  }
 0x34b   : > { %799 = vrot.lane.b32.xlu1 %v2525_v60, %s2229_s29  ;;  %797 = vrot.lane.b32.xlu0 %v2522_v59, %s2229_s29  ;;  %s2244_s29 = smov 126  }
 0x34f   : > { %823 = vrot.lane.b32.xlu1 %v2525_v60, %s2230_s12  ;;  %821 = vrot.lane.b32.xlu0 %v2522_v59, %s2230_s12  ;;  %s2245_s12 = smov 125  }
 0x353   : > { %847 = vrot.lane.b32.xlu1 %v2525_v60, %s2231_s11  ;;  %845 = vrot.lane.b32.xlu0 %v2522_v59, %s2231_s11  ;;  %s2246_s11 = smov 115  }
 0x357   : > { %871 = vrot.lane.b32.xlu1 %v2525_v60, %s2232_s13  ;;  %869 = vrot.lane.b32.xlu0 %v2522_v59, %s2232_s13  ;;  %s2247_s13 = smov 114  }
 0x35b   : > { %895 = vrot.lane.b32.xlu1 %v2525_v60, %s2233_s14  ;;  %893 = vrot.lane.b32.xlu0 %v2522_v59, %s2233_s14  ;;  %s2248_s14 = smov 113  }
 0x35f   : > { %919 = vrot.lane.b32.xlu1 %v2525_v60, %s2234_s20  ;;  %917 = vrot.lane.b32.xlu0 %v2522_v59, %s2234_s20  ;;  %s2249_s20 = smov 112  }
 0x363   : > { %943 = vrot.lane.b32.xlu1 %v2525_v60, %s2235_s25  ;;  %941 = vrot.lane.b32.xlu0 %v2522_v59, %s2235_s25  ;;  %s2250_s25 = smov 111  }
 0x367   : > { %967 = vrot.lane.b32.xlu1 %v2525_v60, %s2236_s30  ;;  %965 = vrot.lane.b32.xlu0 %v2522_v59, %s2236_s30 }
 0x36b   : > { %991 = vrot.lane.b32.xlu1 %v2525_v60, %s2237_s7  ;;  %989 = vrot.lane.b32.xlu0 %v2522_v59, %s2237_s7  ;;  %s2251_s7 = smov 110  }
 0x36f   : > { %1015 = vrot.lane.b32.xlu1 %v2525_v60, %s2238_s8  ;;  %1013 = vrot.lane.b32.xlu0 %v2522_v59, %s2238_s8  ;;  %s2252_s8 = smov 109  }
 0x373   : > { %1039 = vrot.lane.b32.xlu1 %v2525_v60, %s2239_s21  ;;  %1037 = vrot.lane.b32.xlu0 %v2522_v59, %s2239_s21  ;;  %s2253_s21 = smov 99  }
 0x377   : > { %1063 = vrot.lane.b32.xlu1 %v2525_v60, %s2240_s23  ;;  %1061 = vrot.lane.b32.xlu0 %v2522_v59, %s2240_s23  ;;  %s2254_s23 = smov 98  }
 0x37b   : > { %1087 = vrot.lane.b32.xlu1 %v2525_v60, %s2241_s24  ;;  %1085 = vrot.lane.b32.xlu0 %v2522_v59, %s2241_s24  ;;  %s2255_s24 = smov 97  }
 0x37f   : > { %1111 = vrot.lane.b32.xlu1 %v2525_v60, %s2242_s26  ;;  %1109 = vrot.lane.b32.xlu0 %v2522_v59, %s2242_s26  ;;  %s2256_s26 = smov 96  }
 0x383   : > { %1152 = vrot.lane.b32.xlu1 %v2525_v60, %s2243_s28  ;;  %1150 = vrot.lane.b32.xlu0 %v2522_v59, %s2243_s28  ;;  %s2257_s28 = smov 95  }
 0x387   : > { %1176 = vrot.lane.b32.xlu1 %v2525_v60, %s2244_s29  ;;  %1174 = vrot.lane.b32.xlu0 %v2522_v59, %s2244_s29  ;;  %s2258_s29 = smov 94  }
 0x38b   : > { %1200 = vrot.lane.b32.xlu1 %v2525_v60, %s2245_s12  ;;  %1198 = vrot.lane.b32.xlu0 %v2522_v59, %s2245_s12  ;;  %s2259_s12 = smov 93  }
 0x38f   : > { %1224 = vrot.lane.b32.xlu1 %v2525_v60, %s2246_s11  ;;  %1222 = vrot.lane.b32.xlu0 %v2522_v59, %s2246_s11  ;;  %s2260_s11 = smov 83  }
 0x393   : > { %1248 = vrot.lane.b32.xlu1 %v2525_v60, %s2247_s13  ;;  %1246 = vrot.lane.b32.xlu0 %v2522_v59, %s2247_s13  ;;  %s2261_s13 = smov 82  }
 0x395   : > { %v563_v63 = vpop.permute.xlu1 %562  ;;  %v561_v3 = vpop.permute.xlu0 %560 }
 0x396   : > { %v565_v7 = vsel %vm564_vm8, %v561_v3, %v563_v63  ;;  %v566_v8 = vsel %vm564_vm8, %v563_v63, %v561_v3  ;;  %vm945_vm8 = vcmp.lt.s32.totalorder %v2468_v22, 17 }
 0x397   : > { %1272 = vrot.lane.b32.xlu1 %v2525_v60, %s2248_s14  ;;  %1270 = vrot.lane.b32.xlu0 %v2522_v59, %s2248_s14  ;;  %v579_v17 = vmul.f32 %v1882_v61, %v566_v8  ;;  %v580_v26 = vmul.f32 %v576_v9, %v565_v7  ;;  %v718_v8 = vcombine.high %v1888_v55, %v1888_v55  ;;  %v1889_v9 = vld.sshfl [vmem:[#allocation5 + $0x1c] sm:$0x33 pattern:$0x76325410]  ;;  %s2262_s14 = smov 81  }
 0x399   : > { %v584_v15 = vpop.permute.xlu1 %583  ;;  %v582_v16 = vpop.permute.xlu0 %581 }
 0x39a   : > { %v586_v23 = vsel %vm585_vm9, %v582_v16, %v584_v15  ;;  %v587_v5 = vsel %vm585_vm9, %v584_v15, %v582_v16  ;;  %vm969_vm9 = vcmp.lt.s32.totalorder %v2468_v22, 16 }
 0x39b   : > { %v601_v2 = vmul.f32 %v1883_v62, %v587_v5  ;;  %v602_v27 = vmul.f32 %v598_v12, %v586_v23  ;;  %1296 = vrot.lane.b32.xlu1 %v2525_v60, %s2249_s20  ;;  %1294 = vrot.lane.b32.xlu0 %v2522_v59, %s2249_s20  ;;  %s2263_s20 = smov 80  }
 0x39d   : > { %v603_v28 = vadd.f32 %v601_v2, %v579_v17  ;;  %v604_v29 = vadd.f32 %v602_v27, %v580_v26  ;;  %v608_v30 = vpop.permute.xlu1 %607  ;;  %v606_v31 = vpop.permute.xlu0 %605  ;;  %v742_v26 = vcombine.high %v1889_v9, %v1889_v9  ;;  %v1890_v2 = vld.sshfl [vmem:[#allocation5 + $0x20] sm:$0x33 pattern:$0x76325410] }
 0x39e   : > { %v610_v10 = vsel %vm609_vm10, %v606_v31, %v608_v30  ;;  %v611_v32 = vsel %vm609_vm10, %v608_v30, %v606_v31  ;;  %vm993_vm10 = vcmp.lt.s32.totalorder %v2468_v22, 15 }
 0x39f   : > { %v625_v33 = vmul.f32 %v1884_v14, %v611_v32  ;;  %v626_v11 = vmul.f32 %v622_v6, %v610_v10  ;;  %1320 = vrot.lane.b32.xlu1 %v2525_v60, %s2250_s25  ;;  %1318 = vrot.lane.b32.xlu0 %v2522_v59, %s2250_s25  ;;  %s2264_s25 = smov 79  }
 0x3a1   : > { %v627_v36 = vadd.f32 %v625_v33, %v603_v28  ;;  %v628_v37 = vadd.f32 %v626_v11, %v604_v29  ;;  %v632_v38 = vpop.permute.xlu1 %631  ;;  %v630_v39 = vpop.permute.xlu0 %629  ;;  %v766_v33 = vcombine.high %v1890_v2, %v1890_v2  ;;  %v1891_v11 = vld.sshfl [vmem:[#allocation5 + $0x24] sm:$0x33 pattern:$0x76325410] }
 0x3a2   : > { %v634_v40 = vsel %vm633_vm11, %v630_v39, %v632_v38  ;;  %v635_v41 = vsel %vm633_vm11, %v632_v38, %v630_v39  ;;  %vm1017_vm11 = vcmp.lt.s32.totalorder %v2468_v22, 14 }
 0x3a3   : > { %v649_v42 = vmul.f32 %v1885_v1, %v635_v41  ;;  %v650_v43 = vmul.f32 %v646_v34, %v634_v40  ;;  %1344 = vrot.lane.b32.xlu1 %v2525_v60, %s2251_s7  ;;  %1342 = vrot.lane.b32.xlu0 %v2522_v59, %s2251_s7  ;;  %s2265_s7 = smov 78  }
 0x3a5   : > { %v651_v46 = vadd.f32 %v649_v42, %v627_v36  ;;  %v652_v47 = vadd.f32 %v650_v43, %v628_v37  ;;  %v656_v48 = vpop.permute.xlu1 %655  ;;  %v654_v49 = vpop.permute.xlu0 %653  ;;  %v790_v42 = vcombine.high %v1891_v11, %v1891_v11  ;;  %v1892_v43 = vld.sshfl [vmem:[#allocation5 + $0x28] sm:$0x33 pattern:$0x76325410] }
 0x3a6   : > { %v658_v50 = vsel %vm657_vm12, %v654_v49, %v656_v48  ;;  %v659_v51 = vsel %vm657_vm12, %v656_v48, %v654_v49  ;;  %vm1041_vm12 = vcmp.lt.s32.totalorder %v2468_v22, 13 }
 0x3a7   : > { %v673_v52 = vmul.f32 %v1886_v35, %v659_v51  ;;  %v674_v53 = vmul.f32 %v670_v44, %v658_v50  ;;  %1368 = vrot.lane.b32.xlu1 %v2525_v60, %s2252_s8  ;;  %1366 = vrot.lane.b32.xlu0 %v2522_v59, %s2252_s8  ;;  %s2266_s8 = smov 77  }
 0x3a9   : > { %v675_v56 = vadd.f32 %v673_v52, %v651_v46  ;;  %v676_v57 = vadd.f32 %v674_v53, %v652_v47  ;;  %v680_v58 = vpop.permute.xlu1 %679  ;;  %v678_v61 = vpop.permute.xlu0 %677  ;;  %v814_v52 = vcombine.high %v1892_v43, %v1892_v43  ;;  %v1893_v53 = vld.sshfl [vmem:[#allocation5 + $0x2c] sm:$0x33 pattern:$0x76325410] }
 0x3aa   : > { %v682_v62 = vsel %vm681_vm13, %v678_v61, %v680_v58  ;;  %v683_v63 = vsel %vm681_vm13, %v680_v58, %v678_v61  ;;  %vm1065_vm13 = vcmp.lt.s32.totalorder %v2468_v22, 3 }
 0x3ab   : > { %v697_v3 = vmul.f32 %v1887_v45, %v683_v63  ;;  %v698_v7 = vmul.f32 %v694_v54, %v682_v62  ;;  %1392 = vrot.lane.b32.xlu1 %v2525_v60, %s2253_s21  ;;  %1390 = vrot.lane.b32.xlu0 %v2522_v59, %s2253_s21  ;;  %s1939_s21 = sshll.u32 %s2315_s19, 10 }
 0x3ac   : > { %s2937_s19 = scalar_lea.hbm %s2991_s4, %s1939_s21 }
 0x3ad   : > { %v699_v12 = vadd.f32 %v697_v3, %v675_v56  ;;  %v700_v14 = vadd.f32 %v698_v7, %v676_v57  ;;  %v704_v15 = vpop.permute.xlu1 %703  ;;  %v702_v16 = vpop.permute.xlu0 %701  ;;  %v838_v3 = vcombine.high %v1893_v53, %v1893_v53  ;;  %v1894_v7 = vld.sshfl [vmem:[#allocation5 + $0x30] sm:$0x33 pattern:$0x76325410] }
 0x3ae   : > { %v706_v17 = vsel %vm705_vm14, %v702_v16, %v704_v15  ;;  %v707_v23 = vsel %vm705_vm14, %v704_v15, %v702_v16  ;;  %vm1089_vm14 = vcmp.lt.s32.totalorder %v2468_v22, 2 }
 0x3af   : > { %v721_v5 = vmul.f32 %v1888_v55, %v707_v23  ;;  %v722_v6 = vmul.f32 %v718_v8, %v706_v17  ;;  %1416 = vrot.lane.b32.xlu1 %v2525_v60, %s2254_s23  ;;  %1414 = vrot.lane.b32.xlu0 %v2522_v59, %s2254_s23  ;;  %s230_s23 = scalar_lea.vmem [#allocation7], %s1875_s6  ;;  %s1771_s6 = scalar_lea.sflag [#allocation4], %s2410_s5 }
 0x3b1   : > { %v723_v27 = vadd.f32 %v721_v5, %v699_v12  ;;  %v724_v1 = vadd.f32 %v722_v6, %v700_v14  ;;  %v728_v28 = vpop.permute.xlu1 %727  ;;  %v726_v29 = vpop.permute.xlu0 %725  ;;  %v862_v5 = vcombine.high %v1894_v7, %v1894_v7  ;;  %v1895_v6 = vld.sshfl [vmem:[#allocation5 + $0x34] sm:$0x33 pattern:$0x76325410] }
 0x3b2   : > { %v730_v30 = vsel %vm729_vm15, %v726_v29, %v728_v28  ;;  %v731_v31 = vsel %vm729_vm15, %v728_v28, %v726_v29  ;;  %vm1113_vm15 = vcmp.lt.s32.totalorder %v2468_v22, 1 }
 0x3b3   : > { %v745_v10 = vmul.f32 %v1889_v9, %v731_v31  ;;  %v746_v32 = vmul.f32 %v742_v26, %v730_v30  ;;  %1440 = vrot.lane.b32.xlu1 %v2525_v60, %s2255_s24  ;;  %1438 = vrot.lane.b32.xlu0 %v2522_v59, %s2255_s24  ;;  %s1784_s24 = sshll.u32 %s230_s23, 4  ;;  %s2943_s24 = int_to_ptr.vmem [resolvable:$true] %s1784_s24 }
 0x3b5   : > { %v747_v34 = vadd.f32 %v745_v10, %v723_v27  ;;  %v748_v35 = vadd.f32 %v746_v32, %v724_v1  ;;  %v752_v36 = vpop.permute.xlu1 %751  ;;  %v750_v37 = vpop.permute.xlu0 %749  ;;  %v886_v10 = vcombine.high %v1895_v6, %v1895_v6  ;;  %v1896_v32 = vld.sshfl [vmem:[#allocation5 + $0x38] sm:$0x33 pattern:$0x76325410] }
 0x3b6   : > { %v754_v38 = vsel %vm753_vm0, %v750_v37, %v752_v36  ;;  %v755_v39 = vsel %vm753_vm0, %v752_v36, %v750_v37  ;;  %vm1154_vm0 = vcmp.lt.s32.totalorder %v2468_v22, 127 }
 0x3b7   : > { %v769_v40 = vmul.f32 %v1890_v2, %v755_v39  ;;  %v770_v41 = vmul.f32 %v766_v33, %v754_v38  ;;  %1464 = vrot.lane.b32.xlu1 %v2525_v60, %s2256_s26  ;;  %1462 = vrot.lane.b32.xlu0 %v2522_v59, %s2256_s26 }
 0x3b9   : > { %v771_v44 = vadd.f32 %v769_v40, %v747_v34  ;;  %v772_v45 = vadd.f32 %v770_v41, %v748_v35  ;;  %v776_v46 = vpop.permute.xlu1 %775  ;;  %v774_v47 = vpop.permute.xlu0 %773  ;;  %v910_v40 = vcombine.high %v1896_v32, %v1896_v32 }
 0x3ba   : > { %v778_v48 = vsel %vm777_vm1, %v774_v47, %v776_v46  ;;  %v779_v49 = vsel %vm777_vm1, %v776_v46, %v774_v47  ;;  %vm1178_vm1 = vcmp.lt.s32.totalorder %v2468_v22, 126 }
 0x3bb   : > { %v793_v50 = vmul.f32 %v1891_v11, %v779_v49  ;;  %v794_v51 = vmul.f32 %v790_v42, %v778_v48  ;;  %1488 = vrot.lane.b32.xlu1 %v2525_v60, %s2257_s28  ;;  %1486 = vrot.lane.b32.xlu0 %v2522_v59, %s2257_s28 }
 0x3bd   : > { %v795_v54 = vadd.f32 %v793_v50, %v771_v44  ;;  %v796_v55 = vadd.f32 %v794_v51, %v772_v45  ;;  %v800_v56 = vpop.permute.xlu1 %799  ;;  %v798_v57 = vpop.permute.xlu0 %797 }
 0x3be   : > { %v802_v58 = vsel %vm801_vm2, %v798_v57, %v800_v56  ;;  %v803_v61 = vsel %vm801_vm2, %v800_v56, %v798_v57  ;;  %vm1202_vm2 = vcmp.lt.s32.totalorder %v2468_v22, 125 }
 0x3bf   : > { %v817_v62 = vmul.f32 %v1892_v43, %v803_v61  ;;  %v818_v63 = vmul.f32 %v814_v52, %v802_v58  ;;  %1512 = vrot.lane.b32.xlu1 %v2525_v60, %s2258_s29  ;;  %1510 = vrot.lane.b32.xlu0 %v2522_v59, %s2258_s29  ;;  %s2141_s29 = scalar_lea.vmem %s2943_s24, 1024 }
 0x3c0   : > { %p2142_p3 = scmp.ne.s32.totalorder %s2943_s24, %s2141_s29 }
 0x3c1   : > { %v819_v8 = vadd.f32 %v817_v62, %v795_v54  ;;  %v820_v9 = vadd.f32 %v818_v63, %v796_v55  ;;  %v824_v12 = vpop.permute.xlu1 %823  ;;  %v822_v14 = vpop.permute.xlu0 %821 }
 0x3c2   : > { %v826_v15 = vsel %vm825_vm3, %v822_v14, %v824_v12  ;;  %v827_v16 = vsel %vm825_vm3, %v824_v12, %v822_v14  ;;  %vm1226_vm3 = vcmp.lt.s32.totalorder %v2468_v22, 115  ;;  %p2143_p7 = pnand %p2142_p3, %p3019_p11 }
 0x3c3   : > { %v841_v17 = vmul.f32 %v1893_v53, %v827_v16  ;;  %v842_v23 = vmul.f32 %v838_v3, %v826_v15  ;;  %1536 = vrot.lane.b32.xlu1 %v2525_v60, %s2259_s12  ;;  %1534 = vrot.lane.b32.xlu0 %v2522_v59, %s2259_s12  ;;  %s2267_s12 = smov [#allocation7]  }
 0x3c4   : > { %p2144_p12 = pneg %p2143_p7 }
 0x3c5   : > { %v843_v26 = vadd.f32 %v841_v17, %v819_v8  ;;  %v844_v2 = vadd.f32 %v842_v23, %v820_v9  ;;  %v848_v27 = vpop.permute.xlu1 %847  ;;  %v846_v1 = vpop.permute.xlu0 %845 }
 0x3c6   : > { %v850_v28 = vsel %vm849_vm4, %v846_v1, %v848_v27  ;;  %v851_v29 = vsel %vm849_vm4, %v848_v27, %v846_v1  ;;  %v1897_v1 = vld.sshfl [vmem:[#allocation5 + $0x3c] sm:$0x33 pattern:$0x76325410]  ;;  %vm1250_vm4 = vcmp.lt.s32.totalorder %v2468_v22, 114 }
 0x3c7   : > { %v865_v30 = vmul.f32 %v1894_v7, %v851_v29  ;;  %v866_v31 = vmul.f32 %v862_v5, %v850_v28  ;;  %1560 = vrot.lane.b32.xlu1 %v2525_v60, %s2260_s11  ;;  %1558 = vrot.lane.b32.xlu0 %v2522_v59, %s2260_s11  ;;  %s2145_s11 = sshll.u32 %s2267_s12, 4  ;;  %s2146_s11 = int_to_ptr.vmem [resolvable:$false] %s2145_s11 }
 0x3c8   : > { %p2148_p10 = scmp.lt.s32.totalorder %s2943_s24, %s2146_s11 }
 0x3c9   : > { %v867_v33 = vadd.f32 %v865_v30, %v843_v26  ;;  %v868_v11 = vadd.f32 %v866_v31, %v844_v2  ;;  %v872_v34 = vpop.permute.xlu1 %871  ;;  %v870_v35 = vpop.permute.xlu0 %869  ;;  %v1898_v30 = vld.sshfl [vmem:[#allocation5 + $0x40] sm:$0x33 pattern:$0x76325410]  ;;  %v934_v31 = vcombine.high %v1897_v1, %v1897_v1 }
 0x3ca   : > { %v874_v36 = vsel %vm873_vm5, %v870_v35, %v872_v34  ;;  %v875_v37 = vsel %vm873_vm5, %v872_v34, %v870_v35  ;;  %vm1274_vm5 = vcmp.lt.s32.totalorder %v2468_v22, 113 }
 0x3cb   : > { %v889_v38 = vmul.f32 %v1895_v6, %v875_v37  ;;  %v890_v39 = vmul.f32 %v886_v10, %v874_v36  ;;  %1584 = vrot.lane.b32.xlu1 %v2525_v60, %s2261_s13  ;;  %1582 = vrot.lane.b32.xlu0 %v2522_v59, %s2261_s13  ;;  %s2147_s13 = scalar_lea.vmem %s2146_s11, 2048 }
 0x3cc   : > { %p2149_p2 = scmp.lt.s32.totalorder %s2147_s13, %s2141_s29 }
 0x3cd   : > { %v891_v41 = vadd.f32 %v889_v38, %v867_v33  ;;  %v892_v42 = vadd.f32 %v890_v39, %v868_v11  ;;  %v896_v43 = vpop.permute.xlu1 %895  ;;  %v894_v44 = vpop.permute.xlu0 %893  ;;  %v1899_v33 = vld.sshfl [vmem:[#allocation5 + $0x44] sm:$0x33 pattern:$0x76325410]  ;;  %v958_v11 = vcombine.high %v1898_v30, %v1898_v30 }
 0x3ce   : > { %v898_v45 = vsel %vm897_vm6, %v894_v44, %v896_v43  ;;  %v899_v46 = vsel %vm897_vm6, %v896_v43, %v894_v44  ;;  %v1900_v38 = vld.sshfl [vmem:[#allocation5 + $0x48] sm:$0x33 pattern:$0x76325410]  ;;  %vm1298_vm6 = vcmp.lt.s32.totalorder %v2468_v22, 112  ;;  %p2150_p13 = por %p2149_p2, %p2148_p10 }
 0x3cf   : > { %v913_v47 = vmul.f32 %v1896_v32, %v899_v46  ;;  %v914_v48 = vmul.f32 %v910_v40, %v898_v45  ;;  %1608 = vrot.lane.b32.xlu1 %v2525_v60, %s2262_s14  ;;  %1606 = vrot.lane.b32.xlu0 %v2522_v59, %s2262_s14 }
 0x3d0   : > { %p2151_p0 = pnand %p2150_p13, %p2144_p12 }
 0x3d1   : > { %v2632_v49 = vadd.f32 %v913_v47, %v891_v41  ;;  %v2634_v50 = vadd.f32 %v914_v48, %v892_v42  ;;  %v920_v51 = vpop.permute.xlu1 %919  ;;  %v918_v52 = vpop.permute.xlu0 %917  ;;  %v982_v41 = vcombine.high %v1899_v33, %v1899_v33  ;;  %v1901_v42 = vld.sshfl [vmem:[#allocation5 + $0x4c] sm:$0x33 pattern:$0x76325410]  ;;  %v1006_v47 = vcombine.high %v1900_v38, %v1900_v38 }
 0x3d2   : > { %v922_v10 = vsel %vm921_vm7, %v918_v52, %v920_v51  ;;  %v923_v32 = vsel %vm921_vm7, %v920_v51, %v918_v52  ;;  %v1902_v48 = vld.sshfl [vmem:[#allocation5 + $0x50] sm:$0x33 pattern:$0x76325410]  ;;  %vm1322_vm7 = vcmp.lt.s32.totalorder %v2468_v22, 111 }
 0x3d3   : > { %1632 = vrot.lane.b32.xlu1 %v2525_v60, %s2263_s20  ;;  %1630 = vrot.lane.b32.xlu0 %v2522_v59, %s2263_s20  ;;  %v937_v39 = vmul.f32 %v1897_v1, %v923_v32  ;;  %v938_v40 = vmul.f32 %v934_v31, %v922_v10  ;;  %v1030_v1 = vcombine.high %v1901_v42, %v1901_v42 }
 0x3d5   : > { %v944_v53 = vpop.permute.xlu1 %943  ;;  %v942_v54 = vpop.permute.xlu0 %941  ;;  %v939_v31 = vadd.f32 %v937_v39, %v2632_v49  ;;  %v940_v10 = vadd.f32 %v938_v40, %v2634_v50  ;;  %v1905_v40 = vld.sshfl [vmem:[#allocation5 + $0x5c] sm:$0x33 pattern:$0x76325410] }
 0x3d6   : > { %v946_v36 = vsel %vm945_vm8, %v942_v54, %v944_v53  ;;  %v947_v37 = vsel %vm945_vm8, %v944_v53, %v942_v54  ;;  %vm1346_vm8 = vcmp.lt.s32.totalorder %v2468_v22, 110 }
 0x3d7   : > { %1656 = vrot.lane.b32.xlu1 %v2525_v60, %s2264_s25  ;;  %1654 = vrot.lane.b32.xlu0 %v2522_v59, %s2264_s25  ;;  %v961_v45 = vmul.f32 %v1898_v30, %v947_v37  ;;  %v962_v46 = vmul.f32 %v958_v11, %v946_v36  ;;  %v1903_v30 = vld.sshfl [vmem:[#allocation5 + $0x54] sm:$0x33 pattern:$0x76325410]  ;;  %v1054_v36 = vcombine.high %v1902_v48, %v1902_v48 }
 0x3d9   : > { %v968_v55 = vpop.permute.xlu1 %967  ;;  %v966_v56 = vpop.permute.xlu0 %965  ;;  %v963_v37 = vadd.f32 %v961_v45, %v939_v31  ;;  %v964_v0 = vadd.f32 %v962_v46, %v940_v10 }
 0x3da   : > { %v970_v43 = vsel %vm969_vm9, %v966_v56, %v968_v55  ;;  %v971_v44 = vsel %vm969_vm9, %v968_v55, %v966_v56  ;;  %vm1370_vm9 = vcmp.lt.s32.totalorder %v2468_v22, 109 }
 0x3db   : > { %1680 = vrot.lane.b32.xlu1 %v2525_v60, %s2265_s7  ;;  %1678 = vrot.lane.b32.xlu0 %v2522_v59, %s2265_s7  ;;  %v985_v55 = vmul.f32 %v1899_v33, %v971_v44  ;;  %v986_v56 = vmul.f32 %v982_v41, %v970_v43 }
 0x3dd   : > { %v992_v57 = vpop.permute.xlu1 %991  ;;  %v990_v58 = vpop.permute.xlu0 %989  ;;  %v988_v33 = vadd.f32 %v986_v56, %v964_v0 }
 0x3de   : > { %v994_v53 = vsel %vm993_vm10, %v990_v58, %v992_v57  ;;  %v995_v54 = vsel %vm993_vm10, %v992_v57, %v990_v58  ;;  %v1904_v57 = vld.sshfl [vmem:[#allocation5 + $0x58] sm:$0x33 pattern:$0x76325410]  ;;  %vm1394_vm10 = vcmp.lt.s32.totalorder %v2468_v22, 99 }
 0x3df   : > { %1704 = vrot.lane.b32.xlu1 %v2525_v60, %s2266_s8  ;;  %1702 = vrot.lane.b32.xlu0 %v2522_v59, %s2266_s8  ;;  %v1009_v25 = vmul.f32 %v1900_v38, %v995_v54  ;;  %v1010_v19 = vmul.f32 %v1006_v47, %v994_v53  ;;  %v1102_v44 = vcombine.high %v1904_v57, %v1904_v57 }
 0x3e1   : > { %v1016_v61 = vpop.permute.xlu1 %1015  ;;  %v1014_v62 = vpop.permute.xlu0 %1013 }
 0x3e2   : > { %v1018_v32 = vsel %vm1017_vm11, %v1014_v62, %v1016_v61  ;;  %v1019_v11 = vsel %vm1017_vm11, %v1016_v61, %v1014_v62  ;;  %v1078_v61 = vcombine.high %v1903_v30, %v1903_v30  ;;  %v987_v62 = vadd.f32 %v985_v55, %v963_v37 }
 0x3e3   : > { %v1033_v38 = vmul.f32 %v1901_v42, %v1019_v11  ;;  %v1034_v39 = vmul.f32 %v1030_v1, %v1018_v32  ;;  %vm1418_vm11 = vcmp.lt.s32.totalorder %v2468_v22, 98 }
 0x3e5   : > { %v2644_v63 = vpop.permute.xlu1 %1039  ;;  %v2646_v3 = vpop.permute.xlu0 %1037 }
 0x3e6   : > { %v1042_v49 = vsel %vm1041_vm12, %v2646_v3, %v2644_v63  ;;  %v1043_v50 = vsel %vm1041_vm12, %v2644_v63, %v2646_v3  ;;  %v1011_v63 = vadd.f32 %v1009_v25, %v987_v62  ;;  %v1012_v3 = vadd.f32 %v1010_v19, %v988_v33 }
 0x3e7   : > { %v1057_v45 = vmul.f32 %v1902_v48, %v1043_v50  ;;  %v1058_v0 = vmul.f32 %v1054_v36, %v1042_v49  ;;  %v1907_v49 = vld.sshfl [vmem:[#allocation5 + $0x64] sm:$0x33 pattern:$0x76325410]  ;;  %vm1442_vm12 = vcmp.lt.s32.totalorder %v2468_v22, 97 }
 0x3e8   : > { %v1035_v53 = vadd.f32 %v1033_v38, %v1011_v63  ;;  %v1036_v25 = vadd.f32 %v1034_v39, %v1012_v3  ;;  %v1167_v39 = vcombine.high %v1907_v49, %v1907_v49 }
 0x3e9   : > { %v2648_v7 = vpop.permute.xlu1 %1063  ;;  %v2650_v8 = vpop.permute.xlu0 %1061 }
 0x3ea   : > { %v1066_v41 = vsel %vm1065_vm13, %v2650_v8, %v2648_v7  ;;  %v1067_v43 = vsel %vm1065_vm13, %v2648_v7, %v2650_v8  ;;  %v1126_v8 = vcombine.high %v1905_v40, %v1905_v40  ;;  %v1059_v31 = vadd.f32 %v1057_v45, %v1035_v53 }
 0x3eb   : > { %v1081_v19 = vmul.f32 %v1903_v30, %v1067_v43  ;;  %v1082_v48 = vmul.f32 %v1078_v61, %v1066_v41  ;;  %v1060_v10 = vadd.f32 %v1058_v0, %v1036_v25  ;;  %v1909_v41 = vld.sshfl [vmem:[#allocation5 + $0x6c] sm:$0x33 pattern:$0x76325410]  ;;  %vm1466_vm13 = vcmp.lt.s32.totalorder %v2468_v22, 96 }
 0x3ec   : > { %v1911_v25 = vld.sshfl [vmem:[#allocation5 + $0x74] sm:$0x33 pattern:$0x76325410] }
 0x3ed   : > { %v2652_v9 = vpop.permute.xlu1 %1087  ;;  %v2654_v12 = vpop.permute.xlu0 %1085  ;;  %v1084_v36 = vadd.f32 %v1082_v48, %v1060_v10 }
 0x3ee   : > { %v1090_v47 = vsel %vm1089_vm14, %v2654_v12, %v2652_v9  ;;  %v1091_v7 = vsel %vm1089_vm14, %v2652_v9, %v2654_v12  ;;  %v1906_v9 = vld.sshfl [vmem:[#allocation5 + $0x60] sm:$0x33 pattern:$0x76325410]  ;;  %v1083_v12 = vadd.f32 %v1081_v19, %v1059_v31  ;;  %vm1490_vm14 = vcmp.lt.s32.totalorder %v2468_v22, 95 }
 0x3ef   : > { %v1105_v55 = vmul.f32 %v1904_v57, %v1091_v7  ;;  %v1106_v56 = vmul.f32 %v1102_v44, %v1090_v47  ;;  %v1143_v62 = vcombine.high %v1906_v9, %v1906_v9  ;;  %v1908_v57 = vld.sshfl [vmem:[#allocation5 + $0x68] sm:$0x33 pattern:$0x76325410]  ;;  %v1146_v63 = vmul.f32 %v1906_v9, %v2522_v59 }
 0x3f0   : > { %v1191_v3 = vcombine.high %v1908_v57, %v1908_v57 }
 0x3f1   : > { %v2656_v14 = vpop.permute.xlu1 %1111  ;;  %v2658_v15 = vpop.permute.xlu0 %1109  ;;  %v1107_v50 = vadd.f32 %v1105_v55, %v1083_v12  ;;  %v1108_v61 = vadd.f32 %v1106_v56, %v1084_v36  ;;  %v1147_v44 = vmul.f32 %v1143_v62, %v2525_v60 }
 0x3f2   : > { %v1114_v54 = vsel %vm1113_vm15, %v2658_v15, %v2656_v14  ;;  %v1115_v1 = vsel %vm1113_vm15, %v2656_v14, %v2658_v15  ;;  %vm1514_vm15 = vcmp.lt.s32.totalorder %v2468_v22, 94 }
 0x3f3   : > { %v1129_v37 = vmul.f32 %v1905_v40, %v1115_v1  ;;  %v1130_v30 = vmul.f32 %v1126_v8, %v1114_v54  ;;  %v1215_v8 = vcombine.high %v1909_v41, %v1909_v41 }
 0x3f5   : > { %v2660_v16 = vpop.permute.xlu1 %1152  ;;  %v2662_v17 = vpop.permute.xlu0 %1150  ;;  %v1131_v33 = vadd.f32 %v1129_v37, %v1107_v50  ;;  %v1132_v38 = vadd.f32 %v1130_v30, %v1108_v61  ;;  %v1913_v37 = vld.sshfl [vmem:[#allocation5 + $0x7c] sm:$0x33 pattern:$0x76325410] }
 0x3f6   : > { %v1155_v40 = vsel %vm1154_vm0, %v2662_v17, %v2660_v16  ;;  %v1156_v43 = vsel %vm1154_vm0, %v2660_v16, %v2662_v17  ;;  %v1910_v16 = vld.sshfl [vmem:[#allocation5 + $0x70] sm:$0x33 pattern:$0x76325410]  ;;  %vm1538_vm0 = vcmp.lt.s32.totalorder %v2468_v22, 93 }
 0x3f7   : > { %v1149_v60 = vadd.f32 %v1147_v44, %v1132_v38  ;;  %v1148_v17 = vadd.f32 %v1146_v63, %v1131_v33  ;;  %v1170_v59 = vmul.f32 %v1907_v49, %v1155_v40  ;;  %v1171_v53 = vmul.f32 %v1167_v39, %v1156_v43  ;;  %v1915_v63 = vld.sshfl [vmem:[#allocation5 + $0x84] sm:$0x33 pattern:$0x76325410] }
 0x3f8   : > { %v1239_v31 = vcombine.high %v1910_v16, %v1910_v16 }
 0x3f9   : > { %v2664_v23 = vpop.permute.xlu1 %1176  ;;  %v2666_v5 = vpop.permute.xlu0 %1174  ;;  %v1172_v56 = vadd.f32 %v1170_v59, %v1148_v17  ;;  %v1173_v9 = vadd.f32 %v1171_v53, %v1149_v60  ;;  %v1916_v60 = vld.sshfl [vmem:[#allocation5 + $0x88] sm:$0x33 pattern:$0x76325410] }
 0x3fa   : > { %v1179_v47 = vsel %vm1178_vm1, %v2666_v5, %v2664_v23  ;;  %v1180_v7 = vsel %vm1178_vm1, %v2664_v23, %v2666_v5  ;;  %v1912_v23 = vld.sshfl [vmem:[#allocation5 + $0x78] sm:$0x33 pattern:$0x76325410]  ;;  %vm1562_vm1 = vcmp.lt.s32.totalorder %v2468_v22, 83 }
 0x3fb   : > { %v1194_v54 = vmul.f32 %v1908_v57, %v1179_v47  ;;  %v1195_v1 = vmul.f32 %v1191_v3, %v1180_v7  ;;  %v1287_v50 = vcombine.high %v1912_v23, %v1912_v23  ;;  %v1914_v57 = vld.sshfl [vmem:[#allocation5 + $0x80] sm:$0x33 pattern:$0x76325410] }
 0x3fc   : > { %v1335_v7 = vcombine.high %v1914_v57, %v1914_v57 }
 0x3fd   : > { %v2668_v6 = vpop.permute.xlu1 %1200  ;;  %v2670_v26 = vpop.permute.xlu0 %1198  ;;  %v1196_v61 = vadd.f32 %v1194_v54, %v1172_v56  ;;  %v1197_v62 = vadd.f32 %v1195_v1, %v1173_v9  ;;  %v1917_v1 = vld.sshfl [vmem:[#allocation5 + $0x8c] sm:$0x33 pattern:$0x76325410] }
 0x3fe   : > { %v1203_v19 = vsel %vm1202_vm2, %v2670_v26, %v2668_v6  ;;  %v1204_v48 = vsel %vm1202_vm2, %v2668_v6, %v2670_v26  ;;  %v1263_v26 = vcombine.high %v1911_v25, %v1911_v25  ;;  %v1918_v56 = vld.sshfl [vmem:[#allocation5 + $0x90] sm:$0x33 pattern:$0x76325410]  ;;  %vm1586_vm2 = vcmp.lt.s32.totalorder %v2468_v22, 82 }
 0x3ff   : > { %v1218_v12 = vmul.f32 %v1909_v41, %v1203_v19  ;;  %v1219_v36 = vmul.f32 %v1215_v8, %v1204_v48 }
 0x401   : > { %v2672_v2 = vpop.permute.xlu1 %1224  ;;  %v2674_v27 = vpop.permute.xlu0 %1222  ;;  %v1220_v41 = vadd.f32 %v1218_v12, %v1196_v61  ;;  %v1221_v40 = vadd.f32 %v1219_v36, %v1197_v62  ;;  %v1919_v61 = vld.sshfl [vmem:[#allocation5 + $0x94] sm:$0x33 pattern:$0x76325410] }
 0x402   : > { %v1227_v55 = vsel %vm1226_vm3, %v2674_v27, %v2672_v2  ;;  %v1228_v6 = vsel %vm1226_vm3, %v2672_v2, %v2674_v27  ;;  %vm1610_vm3 = vcmp.lt.s32.totalorder %v2468_v22, 81 }
 0x403   : > { %v1242_v2 = vmul.f32 %v1910_v16, %v1227_v55  ;;  %v1243_v27 = vmul.f32 %v1239_v31, %v1228_v6  ;;  %v1383_v55 = vcombine.high %v1916_v60, %v1916_v60 }
 0x405   : > { %v2677_v28 = vpop.permute.xlu1 %1248  ;;  %v2679_v29 = vpop.permute.xlu0 %1246 }
 0x406   : > { %v1251_v30 = vsel %vm1250_vm4, %v2679_v29, %v2677_v28  ;;  %v1252_v49 = vsel %vm1250_vm4, %v2677_v28, %v2679_v29  ;;  %v1311_v29 = vcombine.high %v1913_v37, %v1913_v37  ;;  %vm1634_vm4 = vcmp.lt.s32.totalorder %v2468_v22, 80 }
 0x407   : > { %v1266_v43 = vmul.f32 %v1911_v25, %v1251_v30  ;;  %v1267_v44 = vmul.f32 %v1263_v26, %v1252_v49 }
 0x409   : > { %v2683_v34 = vpop.permute.xlu1 %1272  ;;  %v2685_v35 = vpop.permute.xlu0 %1270 }
 0x40a   : > { %v1275_v39 = vsel %vm1274_vm5, %v2685_v35, %v2683_v34  ;;  %v1276_v28 = vsel %vm1274_vm5, %v2683_v34, %v2685_v35  ;;  %v1244_v34 = vadd.f32 %v1242_v2, %v1220_v41  ;;  %v1245_v35 = vadd.f32 %v1243_v27, %v1221_v40 }
 0x40b   : > { %v1290_v8 = vmul.f32 %v1912_v23, %v1275_v39  ;;  %v1291_v16 = vmul.f32 %v1287_v50, %v1276_v28  ;;  %v1431_v27 = vcombine.high %v1918_v56, %v1918_v56  ;;  %v1920_v28 = vld.sshfl [vmem:[#allocation5 + $0x98] sm:$0x33 pattern:$0x76325410]  ;;  %vm1658_vm5 = vcmp.lt.s32.totalorder %v2468_v22, 79 }
 0x40c   : > { %v1268_v25 = vadd.f32 %v1266_v43, %v1244_v34  ;;  %v1269_v19 = vadd.f32 %v1267_v44, %v1245_v35  ;;  %v1479_v35 = vcombine.high %v1920_v28, %v1920_v28 }
 0x40d   : > { %v2689_v51 = vpop.permute.xlu1 %1296  ;;  %v2691_v52 = vpop.permute.xlu0 %1294 }
 0x40e   : > { %v1299_v3 = vsel %vm1298_vm6, %v2691_v52, %v2689_v51  ;;  %v1300_v47 = vsel %vm1298_vm6, %v2689_v51, %v2691_v52  ;;  %v1359_v52 = vcombine.high %v1915_v63, %v1915_v63  ;;  %vm1682_vm6 = vcmp.lt.s32.totalorder %v2468_v22, 78 }
 0x40f   : > { %v1314_v48 = vmul.f32 %v1913_v37, %v1299_v3  ;;  %v1315_v54 = vmul.f32 %v1311_v29, %v1300_v47  ;;  %v1921_v47 = vld.sshfl [vmem:[#allocation5 + $0x9c] sm:$0x33 pattern:$0x76325410] }
 0x411   : > { %v2697_v58 = vpop.permute.xlu1 %1320  ;;  %v2699_v21 = vpop.permute.xlu0 %1318 }
 0x412   : > { %v1323_v53 = vsel %vm1322_vm7, %v2699_v21, %v2697_v58  ;;  %v1324_v51 = vsel %vm1322_vm7, %v2697_v58, %v2699_v21  ;;  %v1292_v21 = vadd.f32 %v1290_v8, %v1268_v25  ;;  %v1293_v58 = vadd.f32 %v1291_v16, %v1269_v19 }
 0x413   : > { %v1338_v6 = vmul.f32 %v1914_v57, %v1323_v53  ;;  %v1339_v26 = vmul.f32 %v1335_v7, %v1324_v51  ;;  %vm1706_vm7 = vcmp.lt.s32.totalorder %v2468_v22, 77 }
 0x414   : > { %v1316_v37 = vadd.f32 %v1314_v48, %v1292_v21  ;;  %v1317_v30 = vadd.f32 %v1315_v54, %v1293_v58 }
 0x415   : > { %v2719_v42 = vpop.permute.xlu1 %1344  ;;  %v2721_v46 = vpop.permute.xlu0 %1342 }
 0x416   : > { %v1347_v31 = vsel %vm1346_vm8, %v2721_v46, %v2719_v42  ;;  %v1348_v23 = vsel %vm1346_vm8, %v2719_v42, %v2721_v46  ;;  %v1407_v46 = vcombine.high %v1917_v1, %v1917_v1 }
 0x417   : > { %v1362_v49 = vmul.f32 %v1915_v63, %v1347_v31  ;;  %v1363_v50 = vmul.f32 %v1359_v52, %v1348_v23 }
 0x419   : > { %v2735_v32 = vpop.permute.xlu1 %1368  ;;  %v2737_v11 = vpop.permute.xlu0 %1366 }
 0x41a   : > { %v1371_v36 = vsel %vm1370_vm9, %v2737_v11, %v2735_v32  ;;  %v1372_v42 = vsel %vm1370_vm9, %v2735_v32, %v2737_v11  ;;  %v1340_v32 = vadd.f32 %v1338_v6, %v1316_v37  ;;  %v1341_v11 = vadd.f32 %v1339_v26, %v1317_v30  ;;  %v1924_v6 = vld.sshfl [vmem:[#allocation5 + $0xa8] sm:$0x33 pattern:$0x76325410] }
 0x41b   : > { %v1386_v57 = vmul.f32 %v1916_v60, %v1371_v36  ;;  %v1387_v39 = vmul.f32 %v1383_v55, %v1372_v42  ;;  %v1922_v60 = vld.sshfl [vmem:[#allocation5 + $0xa0] sm:$0x33 pattern:$0x76325410] }
 0x41c   : > { %v1364_v43 = vadd.f32 %v1362_v49, %v1340_v32  ;;  %v1365_v44 = vadd.f32 %v1363_v50, %v1341_v11  ;;  %v1527_v55 = vcombine.high %v1922_v60, %v1922_v60  ;;  %v1925_v49 = vld.sshfl [vmem:[#allocation5 + $0xac] sm:$0x33 pattern:$0x76325410] }
 0x41d   : > { %v2740_v14 = vpop.permute.xlu1 %1392  ;;  %v2742_v15 = vpop.permute.xlu0 %1390  ;;  %v1926_v11 = vld.sshfl [vmem:[#allocation5 + $0xb0] sm:$0x33 pattern:$0x76325410] }
 0x41e   : > { %v1395_v62 = vsel %vm1394_vm10, %v2742_v15, %v2740_v14  ;;  %v1396_v2 = vsel %vm1394_vm10, %v2740_v14, %v2742_v15  ;;  %v1455_v15 = vcombine.high %v1919_v61, %v1919_v61 }
 0x41f   : > { %v1410_v63 = vmul.f32 %v1917_v1, %v1395_v62  ;;  %v1411_v3 = vmul.f32 %v1407_v46, %v1396_v2  ;;  %v1923_v1 = vld.sshfl [vmem:[#allocation5 + $0xa4] sm:$0x33 pattern:$0x76325410]  ;;  %v1575_v62 = vcombine.high %v1924_v6, %v1924_v6 }
 0x421   : > { %v2752_v45 = vpop.permute.xlu1 %1416  ;;  %v2754_v0 = vpop.permute.xlu0 %1414 }
 0x422   : > { %v1419_v40 = vsel %vm1418_vm11, %v2754_v0, %v2752_v45  ;;  %v1420_v14 = vsel %vm1418_vm11, %v2752_v45, %v2754_v0  ;;  %v1388_v45 = vadd.f32 %v1386_v57, %v1364_v43  ;;  %v1389_v0 = vadd.f32 %v1387_v39, %v1365_v44  ;;  %v1927_v43 = vld.sshfl [vmem:[#allocation5 + $0xb4] sm:$0x33 pattern:$0x76325410] }
 0x423   : > { %v1434_v8 = vmul.f32 %v1918_v56, %v1419_v40  ;;  %v1435_v16 = vmul.f32 %v1431_v27, %v1420_v14  ;;  %v1599_v40 = vcombine.high %v1925_v49, %v1925_v49 }
 0x424   : > { %v1412_v25 = vadd.f32 %v1410_v63, %v1388_v45  ;;  %v1413_v19 = vadd.f32 %v1411_v3, %v1389_v0  ;;  %v1623_v3 = vcombine.high %v1926_v11, %v1926_v11 }
 0x425   : > { %v2766_v5 = vpop.permute.xlu1 %1440  ;;  %v2768_v10 = vpop.permute.xlu0 %1438 }
 0x426   : > { %v1443_v7 = vsel %vm1442_vm12, %v2768_v10, %v2766_v5  ;;  %v1444_v34 = vsel %vm1442_vm12, %v2766_v5, %v2768_v10  ;;  %v1503_v10 = vcombine.high %v1921_v47, %v1921_v47 }
 0x427   : > { %v1458_v48 = vmul.f32 %v1919_v61, %v1443_v7  ;;  %v1459_v54 = vmul.f32 %v1455_v15, %v1444_v34 }
 0x429   : > { %v2784_v33 = vpop.permute.xlu1 %1464  ;;  %v2786_v38 = vpop.permute.xlu0 %1462 }
 0x42a   : > { %v1467_v52 = vsel %vm1466_vm13, %v2786_v38, %v2784_v33  ;;  %v1468_v5 = vsel %vm1466_vm13, %v2784_v33, %v2786_v38  ;;  %v1436_v33 = vadd.f32 %v1434_v8, %v1412_v25  ;;  %v1437_v38 = vadd.f32 %v1435_v16, %v1413_v19  ;;  %v1928_v8 = vld.sshfl [vmem:[#allocation5 + $0xb8] sm:$0x33 pattern:$0x76325410] }
 0x42b   : > { %v1482_v21 = vmul.f32 %v1920_v28, %v1467_v52  ;;  %v1483_v58 = vmul.f32 %v1479_v35, %v1468_v5  ;;  %v1929_v25 = vld.sshfl [vmem:[#allocation5 + $0xbc] sm:$0x33 pattern:$0x76325410] }
 0x42c   : > { %v1460_v42 = vadd.f32 %v1458_v48, %v1436_v33  ;;  %v1461_v46 = vadd.f32 %v1459_v54, %v1437_v38  ;;  %v1671_v54 = vcombine.high %v1928_v8, %v1928_v8 }
 0x42d   : > { %v2806_v17 = vpop.permute.xlu1 %1488  ;;  %v2808_v59 = vpop.permute.xlu0 %1486 }
 0x42e   : > { %v1491_v31 = vsel %vm1490_vm14, %v2808_v59, %v2806_v17  ;;  %v1492_v23 = vsel %vm1490_vm14, %v2806_v17, %v2808_v59  ;;  %v1551_v59 = vcombine.high %v1923_v1, %v1923_v1  ;;  %v1484_v2 = vadd.f32 %v1482_v21, %v1460_v42 }
 0x42f   : > { %v1506_v37 = vmul.f32 %v1921_v47, %v1491_v31  ;;  %v1507_v30 = vmul.f32 %v1503_v10, %v1492_v23  ;;  %v1485_v27 = vadd.f32 %v1483_v58, %v1461_v46 }
 0x431   : > { %v2828_v9 = vpop.permute.xlu1 %1512  ;;  %v2830_v12 = vpop.permute.xlu0 %1510 }
 0x432   : > { %v1515_v36 = vsel %vm1514_vm15, %v2830_v12, %v2828_v9  ;;  %v1516_v17 = vsel %vm1514_vm15, %v2828_v9, %v2830_v12 }
 0x433   : > { %v1530_v9 = vmul.f32 %v1922_v60, %v1515_v36  ;;  %v1531_v12 = vmul.f32 %v1527_v55, %v1516_v17 }
 0x435   : > { %v1537_v29 = vpop.permute.xlu1 %1536  ;;  %v1535_v41 = vpop.permute.xlu0 %1534 }
 0x436   : > { %v1539_v50 = vsel %vm1538_vm0, %v1535_v41, %v1537_v29  ;;  %v1540_v61 = vsel %vm1538_vm0, %v1537_v29, %v1535_v41  ;;  %v1508_v29 = vadd.f32 %v1506_v37, %v1484_v2  ;;  %v1509_v41 = vadd.f32 %v1507_v30, %v1485_v27 }
 0x437   : > { %v1554_v14 = vmul.f32 %v1923_v1, %v1539_v50  ;;  %v1555_v15 = vmul.f32 %v1551_v59, %v1540_v61  ;;  %v1930_v59 = vld.sshfl [vmem:[#allocation5 + $0xc0] sm:$0x33 pattern:$0x76325410] }
 0x438   : > { %v1532_v47 = vadd.f32 %v1530_v9, %v1508_v29  ;;  %v1533_v7 = vadd.f32 %v1531_v12, %v1509_v41  ;;  %v1719_v2 = vcombine.high %v1930_v59, %v1930_v59 }
 0x439   : > { %v1561_v53 = vpop.permute.xlu1 %1560  ;;  %v1559_v51 = vpop.permute.xlu0 %1558 }
 0x43a   : > { %v1563_v39 = vsel %vm1562_vm1, %v1559_v51, %v1561_v53  ;;  %v1564_v28 = vsel %vm1562_vm1, %v1561_v53, %v1559_v51  ;;  %v1647_v53 = vcombine.high %v1927_v43, %v1927_v43  ;;  %v1556_v51 = vadd.f32 %v1554_v14, %v1532_v47 }
 0x43b   : > { %v1578_v34 = vmul.f32 %v1924_v6, %v1563_v39  ;;  %v1579_v35 = vmul.f32 %v1575_v62, %v1564_v28  ;;  %v1557_v52 = vadd.f32 %v1555_v15, %v1533_v7  ;;  %v1695_v6 = vcombine.high %v1929_v25, %v1929_v25 }
 0x43d   : > { %v1585_v26 = vpop.permute.xlu1 %1584  ;;  %v1583_v56 = vpop.permute.xlu0 %1582  ;;  %v1580_v1 = vadd.f32 %v1578_v34, %v1556_v51  ;;  %v1581_v31 = vadd.f32 %v1579_v35, %v1557_v52 }
 0x43e   : > { %v1587_v44 = vsel %vm1586_vm2, %v1583_v56, %v1585_v26  ;;  %v1588_v63 = vsel %vm1586_vm2, %v1585_v26, %v1583_v56 }
 0x43f   : > { %v1602_v5 = vmul.f32 %v1925_v49, %v1587_v44  ;;  %v1603_v10 = vmul.f32 %v1599_v40, %v1588_v63 }
 0x441   : > { %v1609_v32 = vpop.permute.xlu1 %1608  ;;  %v1607_v57 = vpop.permute.xlu0 %1606  ;;  %v1604_v26 = vadd.f32 %v1602_v5, %v1580_v1  ;;  %v1605_v56 = vadd.f32 %v1603_v10, %v1581_v31  ;;  %v3016_v1 = vld [vmem:[#allocation11_spill] sm:$0xff] }
 0x442   : > { %v1611_v16 = vsel %vm1610_vm3, %v1607_v57, %v1609_v32  ;;  %v1612_v60 = vsel %vm1610_vm3, %v1609_v32, %v1607_v57 }
 0x443   : > { %v1626_v23 = vmul.f32 %v1926_v11, %v1611_v16  ;;  %v1627_v55 = vmul.f32 %v1623_v3, %v1612_v60 }
 0x445   : > { %v1633_v45 = vpop.permute.xlu1 %1632  ;;  %v1631_v0 = vpop.permute.xlu0 %1630  ;;  %v1628_v42 = vadd.f32 %v1626_v23, %v1604_v26  ;;  %v1629_v46 = vadd.f32 %v1627_v55, %v1605_v56 }
 0x446   : > { %v1635_v19 = vsel %vm1634_vm4, %v1631_v0, %v1633_v45  ;;  %v1636_v48 = vsel %vm1634_vm4, %v1633_v45, %v1631_v0 }
 0x447   : > { %v1650_v36 = vmul.f32 %v1927_v43, %v1635_v19  ;;  %v1651_v17 = vmul.f32 %v1647_v53, %v1636_v48  ;;  %v3015_v48 = vld [vmem:[#allocation12_spill] sm:$0xff] }
 0x449   : > { %v1657_v33 = vpop.permute.xlu1 %1656  ;;  %v1655_v38 = vpop.permute.xlu0 %1654  ;;  %v1652_v27 = vadd.f32 %v1650_v36, %v1628_v42  ;;  %v1653_v9 = vadd.f32 %v1651_v17, %v1629_v46 }
 0x44a   : > { %v1659_v21 = vsel %vm1658_vm5, %v1655_v38, %v1657_v33  ;;  %v1660_v58 = vsel %vm1658_vm5, %v1657_v33, %v1655_v38 }
 0x44b   : > { %v1674_v37 = vmul.f32 %v1928_v8, %v1659_v21  ;;  %v1675_v30 = vmul.f32 %v1671_v54, %v1660_v58 }
 0x44d   : > { %v1681_v49 = vpop.permute.xlu1 %1680  ;;  %v1679_v50 = vpop.permute.xlu0 %1678  ;;  %v1676_v11 = vadd.f32 %v1674_v37, %v1652_v27  ;;  %v1677_v57 = vadd.f32 %v1675_v30, %v1653_v9 }
 0x44e   : > { %v1683_v61 = vsel %vm1682_vm6, %v1679_v50, %v1681_v49  ;;  %v1684_v62 = vsel %vm1682_vm6, %v1681_v49, %v1679_v50 }
 0x44f   : > { %v1698_v12 = vmul.f32 %v1929_v25, %v1683_v61  ;;  %v1699_v32 = vmul.f32 %v1695_v6, %v1684_v62 }
 0x451   : > { %v1705_v39 = vpop.permute.xlu1 %1704  ;;  %v1703_v28 = vpop.permute.xlu0 %1702  ;;  %v1700_v41 = vadd.f32 %v1698_v12, %v1676_v11  ;;  %v1701_v14 = vadd.f32 %v1699_v32, %v1677_v57 }
 0x452   : > { %v1707_v40 = vsel %vm1706_vm7, %v1703_v28, %v1705_v39  ;;  %v1708_v29 = vsel %vm1706_vm7, %v1705_v39, %v1703_v28 }
 0x453   : > { %v1722_v15 = vmul.f32 %v1930_v59, %v1707_v40  ;;  %v1723_v43 = vmul.f32 %v1719_v2, %v1708_v29 }
 0x455   : > { %v1724_v44 = vadd.f32 %v1722_v15, %v1700_v41  ;;  %v1725_v63 = vadd.f32 %v1723_v43, %v1701_v14 }
 0x457   : > { %v1728_v3 = vrot.slane %v1724_v44, 1  ;;  %v1729_v22 = vrot.slane %v1725_v63, 1 }
 0x459   : > { %v1732_v47 = vadd.f32 %v1728_v3, %v1724_v44  ;;  %v1733_v7 = vadd.f32 %v1729_v22, %v1725_v63 }
 0x45b   : > { %v1931_v34 = vmul.f32 -1.442695, %v1732_v47  ;;  %v1932_v35 = vmul.f32 -1.442695, %v1733_v7 }
 0x45d   : > { %2079 = vpow2.f32 %v1931_v34 }
 0x45e   : > { %2081 = vpow2.f32 %v1932_v35 }
 0x46a   : > { %v2080_v45 = vpop.eup %2079 }
 0x46b   : > { %v2082_v0 = vpop.eup %2081  ;;  %v1740_v8 = vadd.f32 1.0, %v2080_v45 }
 0x46c   : > { %v1741_v16 = vadd.f32 1.0, %v2082_v0 }
 0x46d   : > { %2083 = vrcp.f32 %v1740_v8 }
 0x46e   : > { %2085 = vrcp.f32 %v1741_v16 }
 0x47a   : > { %v2084_v60 = vpop.eup %2083 }
 0x47b   : > { %v2086_v53 = vpop.eup %2085  ;;  %v1749_v51 = vrot.slane %v2084_v60, %v2478_v13 }
 0x47c   : > { %v1753_v52 = vrot.slane %v2086_v53, %v2478_v13  ;;  %v3017_v13 = vld [vmem:[#allocation13_spill] sm:$0xff] }
 0x47d   : > { %v1754_v5 = vmul.f32 %v1749_v51, %v2488_v20  ;;  %v1756_v10 = vmul.f32 %v1749_v51, %v2482_v18  ;;  %v1758_v25 = vmul.f32 %v1749_v51, %v2494_v24  ;;  %v1760_v19 = vmul.f32 %v1749_v51, %v2506_v4  ;;  %v3018_v20 = vld [vmem:[#allocation14_spill] sm:$0xff] }
 0x47e   : > { %v1755_v54 = vmul.f32 %v1753_v52, %v3015_v48  ;;  %v1757_v31 = vmul.f32 %v1753_v52, %v3016_v1  ;;  %v1759_v23 = vmul.f32 %v1753_v52, %v3017_v13  ;;  %v1761_v55 = vmul.f32 %v1753_v52, %v3018_v20 }
 0x47f   : > { %1762 = vst [vmem:[%s230_s23] sm:$0xff] %v1754_v5  ;;  %1764 = vst [vmem:[%s230_s23 + $0x10] sm:$0xff] %v1756_v10 }
 0x480   : > { %1766 = vst [vmem:[%s230_s23 + $0x20] sm:$0xff] %v1758_v25  ;;  %1768 = vst [vmem:[%s230_s23 + $0x30] sm:$0xff] %v1760_v19 }
 0x481   : > { %1763 = vst [vmem:[%s230_s23 + $0x8] sm:$0xff] %v1755_v54  ;;  %1765 = vst [vmem:[%s230_s23 + $0x18] sm:$0xff] %v1757_v31 }
 0x482   : > { %1767 = vst [vmem:[%s230_s23 + $0x28] sm:$0xff] %v1759_v23  ;;  %1769 = vst [vmem:[%s230_s23 + $0x38] sm:$0xff] %v1761_v55 }
 0x483   : > { %2154 = shalt.err (!%p2151_p0)
}
 0x484   : > { %s2155_s14 = scalar_lea.hbm %s2937_s19, 1024  ;;  %s2159_s7 = scalar_lea.hbm %s2991_s4, 2048 }
 0x485   : > { %p2156_p5 = scmp.ne.s32.totalorder %s2937_s19, %s2155_s14  ;;  %p2160_p4 = scmp.lt.s32.totalorder %s2937_s19, %s2991_s4 }
 0x486   : > { %p2161_p6 = scmp.lt.s32.totalorder %s2159_s7, %s2155_s14 }
 0x487   : > { %p2157_p9 = pnand %p2156_p5, %p3019_p11 }
 0x488   : > { %p2162_p8 = por %p2161_p6, %p2160_p4 }
 0x489   : > { %p2158_p1 = pneg %p2157_p9 }
 0x48b   : > { %p2163_p3 = pnand %p2162_p8, %p2158_p1 }
 0x48d   : > { %2166 = shalt.err (!%p2163_p3)
}
 0x48e   : > { %s2268_s23 = smov 256  }
 0x48f   : > { %1969 = dma.vmem_to_hbm [thread:$0]  (%p3019_p11), %s2943_s24, 1024, %s2937_s19, %s1771_s6, %s2268_s23, %s2268_s23, %s2236_s30  }
 0x490 PF: > { %s1799_s26 = sand.u32 1, %s2197_s15   ;;  %p3020_p7 = scmp.ne.s32.totalorder %s3001_s22, 0 }
 0x491   : > { %p3021_p12 = scmp.ge.s32.totalorder %s2209_s18, 2  ;;  %s1800_s28 = scalar_lea.sflag [#allocation4], %s1799_s26 }
 0x493   : > { %p1980_p10 = pnand %p3021_p12, %p3020_p7 }
 0x495   : > { %p1981_p2 = pneg %p1980_p10 }
 0x497   : > { %2192 = dma.done.wait (%p1981_p2), %s1800_s28, 1024  }
 0x498   : > { %2194 = vsyncadd (%p1981_p2), %s1800_s28, 4294966272  ;;  %p18_p13 = scmp.ge.s32.totalorder %s2348_s27, 4   ;;  %s3022_s15 = smov %s2201_s16 }
 0x499   : > { %s3023_s16 = smov %s2205_s17  ;;  %s3024_s17 = smov %s2365_s9 }
 0x49a   : > { %s3025_s18 = smov %s2348_s27  ;;  %20 = sbr.rel (!%p18_p13) target bundleno = 6 (0x6), region = 133 }
 0x49f   :  { %1805 = vsyncpa [#allocation3], 1 }
 0x4a0   :  { %1807 = vsyncpa [#allocation3 + $0x1], 1 }
 0x4a1   :  { %1808 = vsyncpa [#allocation6], 1 }
 0x4a2   :  { %1809 = vsyncpa [#allocation4], 1 }
 0x4a3   :  { %1811 = vsyncpa [#allocation4 + $0x1], 1 }

</bundles_post_ra>
